<compile_context>
chip_gen: v6e
topology: v6e:2x2x1
jax: 0.10.0
libtpu: 0.0.40
codegen_flags: <defaults>
</compile_context>

<pallas_src>
import jax
import jax.numpy as jnp
from jax.experimental import pallas as pl
from jax.experimental.pallas import tpu as pltpu


def _vmem_limit_bytes():
    """Scoped-VMEM budget derived from the device (v5e/v6e 128 MiB, v7x 64 MiB)."""
    try:
        cap = int(pltpu.get_tpu_info().vmem_capacity_bytes)
    except Exception:
        cap = 0
    if cap <= 0:
        cap = 64 * 1024 * 1024            # conservative (v7x-sized) fallback
    return int(min(cap * 3 // 4, 96 * 1024 * 1024))


def _pick_vocab_tile(V, H, B, S, L, vmem_limit):
    """VMEM-aware classifier tile: TV == V (single tile, no online-LSE) when the
    whole weight stream fits the budget, else the largest lane-dense tile."""
    # Constant-index resident blocks are double-buffered by the pipeliner (x2).
    resident = 2 * (
        B * 128 * 4                       # token ids (padded int32 tile)
        + V * H * 2                       # bf16 embedding table
        + L * 2 * H * 4 * H * 2           # fused [W_ih; W_hh] (bf16)
        + L * 4 * H * 4                   # summed biases (f32)
        + 4 * L * B * H * 4               # h0, c0, h_out, c_out (f32)
        + B * S * H * 4)                  # encoder outputs (f32)
    resident += B * 2 * H * 4 + 2 * B * 128 * 4     # scratch ([.|.] f32, m/s)
    budget = vmem_limit - resident - (2 << 20)       # 2 MiB headroom

    def stream(tv):                        # double-buffered per-tile traffic
        return 2 * (2 * H * tv * 2 + tv * 4 + B * tv * 4)

    if stream(V) <= budget:
        return V
    for tv in (2048, 1024, 512, 256, 128):
        if V % tv == 0 and stream(tv) <= budget:
            return tv
    return 128 if V % 128 == 0 else V


def _make_kernel(L, B, H, V, NV):
    multi = NV > 1

    def kernel(ids_ref, emb_ref, w_lstm_ref, bl_ref, h0_ref, c0_ref, enc_ref,
               w_cls_ref, bc_ref, *rest):
        if multi:
            out_ref, hout_ref, cout_ref, lse_ref, xh_ref, m_sc, s_sc = rest
        else:
            out_ref, hout_ref, cout_ref, xh_ref = rest
        v = pl.program_id(0)

        # -------- first vocab tile: embed + LSTM stack + attention ----------
        @pl.when(v == 0)
        def _prologue():
            # Embedding lookup as a one-hot MXU matmul against the VMEM-resident
            # bf16 table (no tiny per-row DMAs on the serial prologue); the
            # result equals gathering the f32 row and casting to bf16.
            col = jax.lax.broadcasted_iota(jnp.int32, (B, V), 1)
            onehot = jnp.where(col == ids_ref[...], 1.0, 0.0).astype(jnp.bfloat16)
            x = jnp.dot(onehot, emb_ref[...],
                        preferred_element_type=jnp.float32)          # (B, H) f32
            # nn.Dropout(0.5) is eval-mode identity.
            # TODO(synk): training-mode stochastic dropout not implemented.

            # Stacked LSTMCells, one decode step, unrolled over L.  Fused [x|h]
            # input -> ONE K=2H bf16 MXU matmul per layer (halves MXU launch /
            # drain sequences on this serial critical path).  Gate math and the
            # state update stay f32 (v5e has no bf16 VPU/EUP).
            for l in range(L):
                xh_ref[:, :H] = x
                xh_ref[:, H:] = h0_ref[l]
                gates = (jnp.dot(xh_ref[...].astype(jnp.bfloat16), w_lstm_ref[l],
                                 preferred_element_type=jnp.float32)
                         + bl_ref[l])                                 # (B, 4H)
                i = jax.nn.sigmoid(gates[:, 0 * H:1 * H])
                f = jax.nn.sigmoid(gates[:, 1 * H:2 * H])
                g = jnp.tanh(gates[:, 2 * H:3 * H])
                o = jax.nn.sigmoid(gates[:, 3 * H:4 * H])
                c = f * c0_ref[l] + i * g
                h = o * jnp.tanh(c)
                hout_ref[l] = h
                cout_ref[l] = c
                x = h                                                 # next layer

            # Attention: VPU multiply + XLU reduce (no degenerate N=1 / M=1 MXU
            # matmuls); approx reciprocal runs on the otherwise-idle EUP slot.
            enc = enc_ref[...]                                        # (B, S, H)
            score = jnp.sum(enc * x[:, None, :], axis=-1)             # (B, S)
            smax = jnp.max(score, axis=1, keepdims=True)
            e = jnp.exp(score - smax)
            dist = e * pl.reciprocal(jnp.sum(e, axis=1, keepdims=True),
                                     approx=True)
            value = jnp.sum(dist[:, :, None] * enc, axis=1)           # (B, H)

            # Classifier input [value | h_last]: written once, persists in the
            # scratch across all vocab tiles (one fused K=2H matmul per tile).
            xh_ref[:, :H] = value
            xh_ref[:, H:] = x
            if multi:
                m_sc[...] = jnp.full((B, 1), -jnp.inf, jnp.float32)
                s_sc[...] = jnp.zeros((B, 1), jnp.float32)

        # -------- every vocab tile: one fused classifier matmul -------------
        logits = (jnp.dot(xh_ref[...].astype(jnp.bfloat16), w_cls_ref[...],
                          preferred_element_type=jnp.float32)
                  + bc_ref[...])                                      # (B, TV)

        if multi:
            # Stream raw logits to a per-tile output block (pipelined
            # writeback, no resident (B, V) block) and carry online LSE stats;
            # the "- lse" normalization is a cheap XLA epilogue in the wrapper.
            out_ref[...] = logits
            m_prev = m_sc[...]
            m_new = jnp.maximum(m_prev, jnp.max(logits, axis=-1, keepdims=True))
            s_sc[...] = (s_sc[...] * jnp.exp(m_prev - m_new)
                         + jnp.sum(jnp.exp(logits - m_new), axis=-1,
                                   keepdims=True))
            m_sc[...] = m_new

            @pl.when(v == NV - 1)
            def _():
                lse_ref[...] = m_sc[...] + jnp.log(s_sc[...])
        else:
            # Single tile: finish log-softmax in-kernel, no LSE machinery.
            m = jnp.max(logits, axis=-1, keepdims=True)
            lse = m + jnp.log(jnp.sum(jnp.exp(logits - m), axis=-1,
                                      keepdims=True))
            out_ref[...] = logits - lse

    return kernel


class AttnDecoderPallas:
    def __init__(self, vocab_size, hid_dim, max_len, n_layers=4, key=None,
                 vocab_tile=None):
        del max_len                        # unused in forward
        self.hid_dim = hid_dim
        self.n_layers = n_layers
        self.vocab_size = vocab_size
        self.vocab_tile = vocab_tile       # None -> VMEM-aware auto selection

        if key is None:
            key = jax.random.PRNGKey(0)
        ks = jax.random.split(key, 7)
        scale = 0.1
        H, L, V = hid_dim, n_layers, vocab_size

        # nn.Embedding(vocab_size, hid_dim); the kernel consumes the bf16 copy.
        self.embedding = scale * jax.random.normal(ks[0], (V, H), jnp.float32)
        self.embedding_bf = self.embedding.astype(jnp.bfloat16)

        # nn.LSTMCell weights (PyTorch (4H, H) convention), pre-transposed and
        # stacked to (L, 2H, 4H) bf16: rows [0:H] act on x, rows [H:2H] on h.
        w_ih = scale * jax.random.normal(ks[1], (L, 4 * H, H), jnp.float32)
        w_hh = scale * jax.random.normal(ks[2], (L, 4 * H, H), jnp.float32)
        self.w_lstm = jnp.concatenate(
            [jnp.transpose(w_ih, (0, 2, 1)), jnp.transpose(w_hh, (0, 2, 1))],
            axis=1).astype(jnp.bfloat16)                       # (L, 2H, 4H)
        b_ih = scale * jax.random.normal(ks[3], (L, 4 * H), jnp.float32)
        b_hh = scale * jax.random.normal(ks[4], (L, 4 * H), jnp.float32)
        self.bias = (b_ih + b_hh).reshape(L, 1, 4 * H)         # f32

        # Classifier Linear(2H -> V), pre-transposed to one fused (2H, V) bf16
        # array: rows [0:H] take the attention value, rows [H:2H] take h_last.
        w_cls = scale * jax.random.normal(ks[5], (V, 2 * H), jnp.float32)
        self.w_cls = w_cls.T.astype(jnp.bfloat16)              # (2H, V)
        self.b_cls = (scale * jax.random.normal(ks[6], (V,), jnp.float32)
                      ).reshape(1, V)

    def __call__(self, enc_outputs, x, state, vocab_tile=None):
        # NOTE: h0/c0 are aliased to the state outputs (input_output_aliases);
        # callers reusing the same (h0, c0) buffers afterwards should pass
        # defensive copies.
        h0, c0 = state
        L, B, H = h0.shape
        S = enc_outputs.shape[1]
        V = self.vocab_size

        vmem_limit = _vmem_limit_bytes()
        TV = vocab_tile or self.vocab_tile or _pick_vocab_tile(
            V, H, B, S, L, vmem_limit)
        assert V % TV == 0
        NV = V // TV

        ids = x.reshape(B, 1).astype(jnp.int32)

        in_specs = [
            pl.BlockSpec((B, 1), lambda v: (0, 0)),                 # token ids
            pl.BlockSpec((V, H), lambda v: (0, 0)),                 # emb table
            pl.BlockSpec((L, 2 * H, 4 * H), lambda v: (0, 0, 0)),   # LSTM W
            pl.BlockSpec((L, 1, 4 * H), lambda v: (0, 0, 0)),       # LSTM bias
            pl.BlockSpec((L, B, H), lambda v: (0, 0, 0)),           # h0
            pl.BlockSpec((L, B, H), lambda v: (0, 0, 0)),           # c0
            pl.BlockSpec((B, S, H), lambda v: (0, 0, 0)),           # enc_outputs
            pl.BlockSpec((2 * H, TV), lambda v: (0, v)),            # W_cls tile
            pl.BlockSpec((1, TV), lambda v: (0, v)),                # b_cls tile
        ]
        if NV == 1:
            out0_spec = pl.BlockSpec((B, V), lambda v: (0, 0))
        else:
            out0_spec = pl.BlockSpec((B, TV), lambda v: (0, v))
        out_shape = [jax.ShapeDtypeStruct((B, V), jnp.float32),
                     jax.ShapeDtypeStruct((L, B, H), jnp.float32),
                     jax.ShapeDtypeStruct((L, B, H), jnp.float32)]
        out_specs = [out0_spec,
                     pl.BlockSpec((L, B, H), lambda v: (0, 0, 0)),
                     pl.BlockSpec((L, B, H), lambda v: (0, 0, 0))]
        scratch = [pltpu.VMEM((B, 2 * H), jnp.float32)]   # fused [.|.] MXU input
        if NV > 1:
            out_shape.append(jax.ShapeDtypeStruct((B, 1), jnp.float32))   # lse
            out_specs.append(pl.BlockSpec((B, 1), lambda v: (0, 0)))
            scratch += [pltpu.VMEM((B, 1), jnp.float32),   # running max
                        pltpu.VMEM((B, 1), jnp.float32)]   # running sum

        kernel = _make_kernel(L=L, B=B, H=H, V=V, NV=NV)

        results = pl.pallas_call(
            kernel,
            out_shape=tuple(out_shape),
            grid_spec=pltpu.PrefetchScalarGridSpec(
                num_scalar_prefetch=0,
                grid=(NV,),
                in_specs=in_specs,
                out_specs=tuple(out_specs),
                scratch_shapes=scratch),
            # h0 -> h_out, c0 -> c_out.
            input_output_aliases={4: 1, 5: 2},
            compiler_params=pltpu.CompilerParams(
                dimension_semantics=("arbitrary",),
                vmem_limit_bytes=vmem_limit),
        )(ids, self.embedding_bf, self.w_lstm, self.bias, h0, c0,
          enc_outputs, self.w_cls, self.b_cls)

        if NV == 1:
            logprobs, h_new, c_new = results
        else:
            raw, h_new, c_new, lse = results
            logprobs = raw - lse          # one cheap XLA pass over (B, V)
        return logprobs, (h_new, c_new)


# ----------------------------------------------------------------------------
# Pure-JAX reference (mirrors the PyTorch forward, using the same fused
# bf16-cast weight streams as the kernel) for the correctness check.
# ----------------------------------------------------------------------------
def reference_forward(dec, enc, x, state):
    H = dec.hid_dim
    emb = dec.embedding[x]                                    # (B, H) f32
    h0, c0 = state
    hs, cs = [], []
    cur = emb
    for l in range(dec.n_layers):
        xh = jnp.concatenate([cur, h0[l]], axis=-1).astype(jnp.bfloat16)
        gates = (jnp.dot(xh, dec.w_lstm[l],
                         preferred_element_type=jnp.float32)
                 + dec.bias[l, 0])
        i = jax.nn.sigmoid(gates[:, 0 * H:1 * H])
        f = jax.nn.sigmoid(gates[:, 1 * H:2 * H])
        g = jnp.tanh(gates[:, 2 * H:3 * H])
        o = jax.nn.sigmoid(gates[:, 3 * H:4 * H])
        c = f * c0[l] + i * g
        h = o * jnp.tanh(c)
        hs.append(h)
        cs.append(c)
        cur = h
    out_t = hs[-1]
    score = jnp.einsum('bsh,bh->bs', enc, out_t)
    dist = jax.nn.softmax(score, axis=1)
    value = jnp.einsum('bs,bsh->bh', dist, enc)
    xh = jnp.concatenate([value, out_t], axis=-1).astype(jnp.bfloat16)
    logits = (jnp.dot(xh, dec.w_cls, preferred_element_type=jnp.float32)
              + dec.b_cls[0])
    return (jax.nn.log_softmax(logits, axis=-1),
            (jnp.stack(hs), jnp.stack(cs)))


if __name__ == "__main__":
    # Lane/sublane-dense small shapes: B mult of 8, H mult of 128.
    B, S, H, V, L = 8, 8, 128, 512, 4
    key = jax.random.PRNGKey(0)
    k_enc, k_tok, k_h, k_c, k_params = jax.random.split(key, 5)

    enc_outputs = jax.random.normal(k_enc, (B, S, H), jnp.float32)
    x_tok = jax.random.randint(k_tok, (B,), 0, V, dtype=jnp.int32)
    h0 = 0.1 * jax.random.normal(k_h, (L, B, H), jnp.float32)
    c0 = 0.1 * jax.random.normal(k_c, (L, B, H), jnp.float32)

    decoder = AttnDecoderPallas(vocab_size=V, hid_dim=H, max_len=10,
                                n_layers=L, key=k_params)

    ref_lp, (ref_h, ref_c) = reference_forward(decoder, enc_outputs, x_tok,
                                               (h0, c0))
    jax.block_until_ready((ref_lp, ref_h, ref_c))

    # 1) Fused single-tile path (auto-selected TV == V for this small vocab):
    #    log-softmax finishes in-kernel, no online-LSE machinery.
    lp1, (h1, c1) = decoder(enc_outputs, x_tok, (jnp.copy(h0), jnp.copy(c0)))
    jax.block_until_ready((lp1, h1, c1))
    assert lp1.shape == (B, V)
    assert h1.shape == (L, B, H) and c1.shape == (L, B, H)
    assert jnp.allclose(lp1, ref_lp, rtol=5e-3, atol=5e-3)
    assert jnp.allclose(h1, ref_h, rtol=2e-3, atol=2e-3)
    assert jnp.allclose(c1, ref_c, rtol=2e-3, atol=2e-3)

    # 2) Streamed multi-tile path (forced TV=256 -> 2 vocab tiles): per-tile
    #    raw-logit outputs + online LSE + XLA "- lse" epilogue.
    lp2, (h2, c2) = decoder(enc_outputs, x_tok, (jnp.copy(h0), jnp.copy(c0)),
                            vocab_tile=256)
    jax.block_until_ready((lp2, h2, c2))
    assert jnp.allclose(lp2, ref_lp, rtol=5e-3, atol=5e-3)
    assert jnp.allclose(h2, ref_h, rtol=2e-3, atol=2e-3)
    assert jnp.allclose(c2, ref_c, rtol=2e-3, atol=2e-3)

    print("KERNEL_OK")
</pallas_src>

<mosaic_0001>
module attributes {stable_mosaic.version = 11 : i64} {
  func.func @kernel(%arg0: i32, %arg1: memref<8x1xi32, #tpu.memory_space<vmem>>, %arg2: memref<512x128xbf16, #tpu.memory_space<vmem>>, %arg3: memref<4x256x512xbf16, #tpu.memory_space<vmem>>, %arg4: memref<4x1x512xf32, #tpu.memory_space<vmem>>, %arg5: memref<4x8x128xf32, #tpu.memory_space<vmem>>, %arg6: memref<4x8x128xf32, #tpu.memory_space<vmem>>, %arg7: memref<8x8x128xf32, #tpu.memory_space<vmem>>, %arg8: memref<256x512xbf16, #tpu.memory_space<vmem>>, %arg9: memref<1x512xf32, #tpu.memory_space<vmem>>, %arg10: memref<8x512xf32, #tpu.memory_space<vmem>>, %arg11: memref<4x8x128xf32, #tpu.memory_space<vmem>>, %arg12: memref<4x8x128xf32, #tpu.memory_space<vmem>>, %arg13: memref<8x256xf32, #tpu.memory_space<vmem>>) attributes {dimension_semantics = [#tpu.dimension_semantics<arbitrary>], iteration_bounds = array<i64: 1>, scalar_prefetch = 0 : i64, scratch_operands = 1 : i64, tpu.core_type = #tpu.core_type<tc>, window_params = [{pipeline_mode = #tpu.pipeline_mode<synchronous>, transform_indices = @transform_0, window_bounds = array<i64: 8, 1>}, {pipeline_mode = #tpu.pipeline_mode<synchronous>, transform_indices = @transform_1, window_bounds = array<i64: 512, 128>}, {pipeline_mode = #tpu.pipeline_mode<synchronous>, transform_indices = @transform_2, window_bounds = array<i64: 4, 256, 512>}, {pipeline_mode = #tpu.pipeline_mode<synchronous>, transform_indices = @transform_3, window_bounds = array<i64: 4, 1, 512>}, {pipeline_mode = #tpu.pipeline_mode<synchronous>, transform_indices = @transform_4, window_bounds = array<i64: 4, 8, 128>}, {pipeline_mode = #tpu.pipeline_mode<synchronous>, transform_indices = @transform_5, window_bounds = array<i64: 4, 8, 128>}, {pipeline_mode = #tpu.pipeline_mode<synchronous>, transform_indices = @transform_6, window_bounds = array<i64: 8, 8, 128>}, {transform_indices = @transform_7, window_bounds = array<i64: 256, 512>}, {transform_indices = @transform_8, window_bounds = array<i64: 1, 512>}, {pipeline_mode = #tpu.pipeline_mode<synchronous>, transform_indices = @transform_9, window_bounds = array<i64: 8, 512>}, {pipeline_mode = #tpu.pipeline_mode<synchronous>, transform_indices = @transform_10, window_bounds = array<i64: 4, 8, 128>}, {pipeline_mode = #tpu.pipeline_mode<synchronous>, transform_indices = @transform_11, window_bounds = array<i64: 4, 8, 128>}]} {
    %c0_i32 = arith.constant 0 : i32
    %0 = arith.cmpi eq, %arg0, %c0_i32 : i32
    %1 = arith.extui %0 : i1 to i32
    %c0_i32_0 = arith.constant 0 : i32
    %2 = arith.cmpi ne, %1, %c0_i32_0 : i32
    scf.if %2 {
      %22 = tpu.iota {dimensions = array<i32: 1>} : vector<8x512xi32>
      %c0_10 = arith.constant 0 : index
      %c0_11 = arith.constant 0 : index
      %23 = vector.load %arg1[%c0_10, %c0_11] : memref<8x1xi32, #tpu.memory_space<vmem>>, vector<8x1xi32>
      %24 = vector.broadcast %23 : vector<8x1xi32> to vector<8x512xi32>
      %25 = arith.cmpi eq, %22, %24 : vector<8x512xi32>
      %cst_12 = arith.constant 1.000000e+00 : f32
      %cst_13 = arith.constant 0.000000e+00 : f32
      %26 = vector.broadcast %cst_12 : f32 to vector<8x512xf32>
      %27 = vector.broadcast %cst_13 : f32 to vector<8x512xf32>
      %28 = arith.select %25, %26, %27 : vector<8x512xi1>, vector<8x512xf32>
      %29 = arith.truncf %28 : vector<8x512xf32> to vector<8x512xbf16>
      %c0_14 = arith.constant 0 : index
      %c0_15 = arith.constant 0 : index
      %30 = vector.load %arg2[%c0_14, %c0_15] : memref<512x128xbf16, #tpu.memory_space<vmem>>, vector<512x128xbf16>
      %cst_16 = arith.constant dense<0.000000e+00> : vector<8x128xf32>
      %31 = tpu.matmul %29, %30, %cst_16 {dimension_numbers = #tpu.dot_dimension_numbers<[1], [0], [0], [1], [0, 0, 1, 1], [], []>} : vector<8x512xbf16>, vector<512x128xbf16>, vector<8x128xf32> -> vector<8x128xf32>
      %c0_17 = arith.constant 0 : index
      %c0_18 = arith.constant 0 : index
      %32 = vector.load %arg13[%c0_17, %c0_18] : memref<8x256xf32, #tpu.memory_space<vmem>>, vector<8x128xf32>
      tpu.vector_store %arg13[%c0_17, %c0_18], %31 {strides = array<i32>} : memref<8x256xf32, #tpu.memory_space<vmem>>, vector<8x128xf32>,
      %c0_19 = arith.constant 0 : index
      %c0_20 = arith.constant 0 : index
      %c0_21 = arith.constant 0 : index
      %33 = vector.load %arg5[%c0_19, %c0_20, %c0_21] : memref<4x8x128xf32, #tpu.memory_space<vmem>>, vector<1x8x128xf32>
      %34 = vector.shape_cast %33 : vector<1x8x128xf32> to vector<8x128xf32>
      %c0_22 = arith.constant 0 : index
      %c128 = arith.constant 128 : index
      %35 = vector.load %arg13[%c0_22, %c128] : memref<8x256xf32, #tpu.memory_space<vmem>>, vector<8x128xf32>
      tpu.vector_store %arg13[%c0_22, %c128], %34 {strides = array<i32>} : memref<8x256xf32, #tpu.memory_space<vmem>>, vector<8x128xf32>,
      %c0_23 = arith.constant 0 : index
      %c0_24 = arith.constant 0 : index
      %36 = vector.load %arg13[%c0_23, %c0_24] : memref<8x256xf32, #tpu.memory_space<vmem>>, vector<8x256xf32>
      %37 = arith.truncf %36 : vector<8x256xf32> to vector<8x256xbf16>
      %c0_25 = arith.constant 0 : index
      %c0_26 = arith.constant 0 : index
      %c0_27 = arith.constant 0 : index
      %38 = vector.load %arg3[%c0_25, %c0_26, %c0_27] : memref<4x256x512xbf16, #tpu.memory_space<vmem>>, vector<1x256x512xbf16>
      %39 = vector.shape_cast %38 : vector<1x256x512xbf16> to vector<256x512xbf16>
      %cst_28 = arith.constant dense<0.000000e+00> : vector<8x512xf32>
      %40 = tpu.matmul %37, %39, %cst_28 {dimension_numbers = #tpu.dot_dimension_numbers<[1], [0], [0], [1], [0, 0, 1, 1], [], []>} : vector<8x256xbf16>, vector<256x512xbf16>, vector<8x512xf32> -> vector<8x512xf32>
      %c0_29 = arith.constant 0 : index
      %c0_30 = arith.constant 0 : index
      %c0_31 = arith.constant 0 : index
      %41 = vector.load %arg4[%c0_29, %c0_30, %c0_31] : memref<4x1x512xf32, #tpu.memory_space<vmem>>, vector<1x1x512xf32>
      %42 = vector.shape_cast %41 : vector<1x1x512xf32> to vector<1x512xf32>
      %43 = vector.broadcast %42 : vector<1x512xf32> to vector<8x512xf32>
      %44 = arith.addf %40, %43 : vector<8x512xf32>
      %45 = vector.extract_strided_slice %44 {offsets = [0, 0], sizes = [8, 128], strides = [1, 1]} : vector<8x512xf32> to vector<8x128xf32>
      %46 = arith.negf %45 : vector<8x128xf32>
      %47 = math.exp %46 : vector<8x128xf32>
      %cst_32 = arith.constant 1.000000e+00 : f32
      %48 = vector.broadcast %cst_32 : f32 to vector<8x128xf32>
      %49 = arith.addf %48, %47 : vector<8x128xf32>
      %50 = arith.divf %48, %49 : vector<8x128xf32>
      %51 = vector.extract_strided_slice %44 {offsets = [0, 128], sizes = [8, 128], strides = [1, 1]} : vector<8x512xf32> to vector<8x128xf32>
      %52 = arith.negf %51 : vector<8x128xf32>
      %53 = math.exp %52 : vector<8x128xf32>
      %cst_33 = arith.constant 1.000000e+00 : f32
      %54 = vector.broadcast %cst_33 : f32 to vector<8x128xf32>
      %55 = arith.addf %54, %53 : vector<8x128xf32>
      %56 = arith.divf %54, %55 : vector<8x128xf32>
      %57 = vector.extract_strided_slice %44 {offsets = [0, 256], sizes = [8, 128], strides = [1, 1]} : vector<8x512xf32> to vector<8x128xf32>
      %58 = math.tanh %57 : vector<8x128xf32>
      %59 = vector.extract_strided_slice %44 {offsets = [0, 384], sizes = [8, 128], strides = [1, 1]} : vector<8x512xf32> to vector<8x128xf32>
      %60 = arith.negf %59 : vector<8x128xf32>
      %61 = math.exp %60 : vector<8x128xf32>
      %cst_34 = arith.constant 1.000000e+00 : f32
      %62 = vector.broadcast %cst_34 : f32 to vector<8x128xf32>
      %63 = arith.addf %62, %61 : vector<8x128xf32>
      %64 = arith.divf %62, %63 : vector<8x128xf32>
      %c0_35 = arith.constant 0 : index
      %c0_36 = arith.constant 0 : index
      %c0_37 = arith.constant 0 : index
      %65 = vector.load %arg6[%c0_35, %c0_36, %c0_37] : memref<4x8x128xf32, #tpu.memory_space<vmem>>, vector<1x8x128xf32>
      %66 = vector.shape_cast %65 : vector<1x8x128xf32> to vector<8x128xf32>
      %67 = arith.mulf %56, %66 : vector<8x128xf32>
      %68 = arith.mulf %50, %58 : vector<8x128xf32>
      %69 = arith.addf %67, %68 : vector<8x128xf32>
      %70 = math.tanh %69 : vector<8x128xf32>
      %71 = arith.mulf %64, %70 : vector<8x128xf32>
      %c0_38 = arith.constant 0 : index
      %c0_39 = arith.constant 0 : index
      %c0_40 = arith.constant 0 : index
      %72 = vector.load %arg11[%c0_38, %c0_39, %c0_40] : memref<4x8x128xf32, #tpu.memory_space<vmem>>, vector<1x8x128xf32>
      %73 = vector.shape_cast %72 : vector<1x8x128xf32> to vector<8x128xf32>
      %74 = vector.shape_cast %71 : vector<8x128xf32> to vector<1x8x128xf32>
      tpu.vector_store %arg11[%c0_38, %c0_39, %c0_40], %74 {strides = array<i32>} : memref<4x8x128xf32, #tpu.memory_space<vmem>>, vector<1x8x128xf32>,
      %c0_41 = arith.constant 0 : index
      %c0_42 = arith.constant 0 : index
      %c0_43 = arith.constant 0 : index
      %75 = vector.load %arg12[%c0_41, %c0_42, %c0_43] : memref<4x8x128xf32, #tpu.memory_space<vmem>>, vector<1x8x128xf32>
      %76 = vector.shape_cast %75 : vector<1x8x128xf32> to vector<8x128xf32>
      %77 = vector.shape_cast %69 : vector<8x128xf32> to vector<1x8x128xf32>
      tpu.vector_store %arg12[%c0_41, %c0_42, %c0_43], %77 {strides = array<i32>} : memref<4x8x128xf32, #tpu.memory_space<vmem>>, vector<1x8x128xf32>,
      %c0_44 = arith.constant 0 : index
      %c0_45 = arith.constant 0 : index
      %78 = vector.load %arg13[%c0_44, %c0_45] : memref<8x256xf32, #tpu.memory_space<vmem>>, vector<8x128xf32>
      tpu.vector_store %arg13[%c0_44, %c0_45], %71 {strides = array<i32>} : memref<8x256xf32, #tpu.memory_space<vmem>>, vector<8x128xf32>,
      %c1 = arith.constant 1 : index
      %c0_46 = arith.constant 0 : index
      %c0_47 = arith.constant 0 : index
      %79 = vector.load %arg5[%c1, %c0_46, %c0_47] : memref<4x8x128xf32, #tpu.memory_space<vmem>>, vector<1x8x128xf32>
      %80 = vector.shape_cast %79 : vector<1x8x128xf32> to vector<8x128xf32>
      %c0_48 = arith.constant 0 : index
      %c128_49 = arith.constant 128 : index
      %81 = vector.load %arg13[%c0_48, %c128_49] : memref<8x256xf32, #tpu.memory_space<vmem>>, vector<8x128xf32>
      tpu.vector_store %arg13[%c0_48, %c128_49], %80 {strides = array<i32>} : memref<8x256xf32, #tpu.memory_space<vmem>>, vector<8x128xf32>,
      %c0_50 = arith.constant 0 : index
      %c0_51 = arith.constant 0 : index
      %82 = vector.load %arg13[%c0_50, %c0_51] : memref<8x256xf32, #tpu.memory_space<vmem>>, vector<8x256xf32>
      %83 = arith.truncf %82 : vector<8x256xf32> to vector<8x256xbf16>
      %c1_52 = arith.constant 1 : index
      %c0_53 = arith.constant 0 : index
      %c0_54 = arith.constant 0 : index
      %84 = vector.load %arg3[%c1_52, %c0_53, %c0_54] : memref<4x256x512xbf16, #tpu.memory_space<vmem>>, vector<1x256x512xbf16>
      %85 = vector.shape_cast %84 : vector<1x256x512xbf16> to vector<256x512xbf16>
      %cst_55 = arith.constant dense<0.000000e+00> : vector<8x512xf32>
      %86 = tpu.matmul %83, %85, %cst_55 {dimension_numbers = #tpu.dot_dimension_numbers<[1], [0], [0], [1], [0, 0, 1, 1], [], []>} : vector<8x256xbf16>, vector<256x512xbf16>, vector<8x512xf32> -> vector<8x512xf32>
      %c1_56 = arith.constant 1 : index
      %c0_57 = arith.constant 0 : index
      %c0_58 = arith.constant 0 : index
      %87 = vector.load %arg4[%c1_56, %c0_57, %c0_58] : memref<4x1x512xf32, #tpu.memory_space<vmem>>, vector<1x1x512xf32>
      %88 = vector.shape_cast %87 : vector<1x1x512xf32> to vector<1x512xf32>
      %89 = vector.broadcast %88 : vector<1x512xf32> to vector<8x512xf32>
      %90 = arith.addf %86, %89 : vector<8x512xf32>
      %91 = vector.extract_strided_slice %90 {offsets = [0, 0], sizes = [8, 128], strides = [1, 1]} : vector<8x512xf32> to vector<8x128xf32>
      %92 = arith.negf %91 : vector<8x128xf32>
      %93 = math.exp %92 : vector<8x128xf32>
      %cst_59 = arith.constant 1.000000e+00 : f32
      %94 = vector.broadcast %cst_59 : f32 to vector<8x128xf32>
      %95 = arith.addf %94, %93 : vector<8x128xf32>
      %96 = arith.divf %94, %95 : vector<8x128xf32>
      %97 = vector.extract_strided_slice %90 {offsets = [0, 128], sizes = [8, 128], strides = [1, 1]} : vector<8x512xf32> to vector<8x128xf32>
      %98 = arith.negf %97 : vector<8x128xf32>
      %99 = math.exp %98 : vector<8x128xf32>
      %cst_60 = arith.constant 1.000000e+00 : f32
      %100 = vector.broadcast %cst_60 : f32 to vector<8x128xf32>
      %101 = arith.addf %100, %99 : vector<8x128xf32>
      %102 = arith.divf %100, %101 : vector<8x128xf32>
      %103 = vector.extract_strided_slice %90 {offsets = [0, 256], sizes = [8, 128], strides = [1, 1]} : vector<8x512xf32> to vector<8x128xf32>
      %104 = math.tanh %103 : vector<8x128xf32>
      %105 = vector.extract_strided_slice %90 {offsets = [0, 384], sizes = [8, 128], strides = [1, 1]} : vector<8x512xf32> to vector<8x128xf32>
      %106 = arith.negf %105 : vector<8x128xf32>
      %107 = math.exp %106 : vector<8x128xf32>
      %cst_61 = arith.constant 1.000000e+00 : f32
      %108 = vector.broadcast %cst_61 : f32 to vector<8x128xf32>
      %109 = arith.addf %108, %107 : vector<8x128xf32>
      %110 = arith.divf %108, %109 : vector<8x128xf32>
      %c1_62 = arith.constant 1 : index
      %c0_63 = arith.constant 0 : index
      %c0_64 = arith.constant 0 : index
      %111 = vector.load %arg6[%c1_62, %c0_63, %c0_64] : memref<4x8x128xf32, #tpu.memory_space<vmem>>, vector<1x8x128xf32>
      %112 = vector.shape_cast %111 : vector<1x8x128xf32> to vector<8x128xf32>
      %113 = arith.mulf %102, %112 : vector<8x128xf32>
      %114 = arith.mulf %96, %104 : vector<8x128xf32>
      %115 = arith.addf %113, %114 : vector<8x128xf32>
      %116 = math.tanh %115 : vector<8x128xf32>
      %117 = arith.mulf %110, %116 : vector<8x128xf32>
      %c1_65 = arith.constant 1 : index
      %c0_66 = arith.constant 0 : index
      %c0_67 = arith.constant 0 : index
      %118 = vector.load %arg11[%c1_65, %c0_66, %c0_67] : memref<4x8x128xf32, #tpu.memory_space<vmem>>, vector<1x8x128xf32>
      %119 = vector.shape_cast %118 : vector<1x8x128xf32> to vector<8x128xf32>
      %120 = vector.shape_cast %117 : vector<8x128xf32> to vector<1x8x128xf32>
      tpu.vector_store %arg11[%c1_65, %c0_66, %c0_67], %120 {strides = array<i32>} : memref<4x8x128xf32, #tpu.memory_space<vmem>>, vector<1x8x128xf32>,
      %c1_68 = arith.constant 1 : index
      %c0_69 = arith.constant 0 : index
      %c0_70 = arith.constant 0 : index
      %121 = vector.load %arg12[%c1_68, %c0_69, %c0_70] : memref<4x8x128xf32, #tpu.memory_space<vmem>>, vector<1x8x128xf32>
      %122 = vector.shape_cast %121 : vector<1x8x128xf32> to vector<8x128xf32>
      %123 = vector.shape_cast %115 : vector<8x128xf32> to vector<1x8x128xf32>
      tpu.vector_store %arg12[%c1_68, %c0_69, %c0_70], %123 {strides = array<i32>} : memref<4x8x128xf32, #tpu.memory_space<vmem>>, vector<1x8x128xf32>,
      %c0_71 = arith.constant 0 : index
      %c0_72 = arith.constant 0 : index
      %124 = vector.load %arg13[%c0_71, %c0_72] : memref<8x256xf32, #tpu.memory_space<vmem>>, vector<8x128xf32>
      tpu.vector_store %arg13[%c0_71, %c0_72], %117 {strides = array<i32>} : memref<8x256xf32, #tpu.memory_space<vmem>>, vector<8x128xf32>,
      %c2 = arith.constant 2 : index
      %c0_73 = arith.constant 0 : index
      %c0_74 = arith.constant 0 : index
      %125 = vector.load %arg5[%c2, %c0_73, %c0_74] : memref<4x8x128xf32, #tpu.memory_space<vmem>>, vector<1x8x128xf32>
      %126 = vector.shape_cast %125 : vector<1x8x128xf32> to vector<8x128xf32>
      %c0_75 = arith.constant 0 : index
      %c128_76 = arith.constant 128 : index
      %127 = vector.load %arg13[%c0_75, %c128_76] : memref<8x256xf32, #tpu.memory_space<vmem>>, vector<8x128xf32>
      tpu.vector_store %arg13[%c0_75, %c128_76], %126 {strides = array<i32>} : memref<8x256xf32, #tpu.memory_space<vmem>>, vector<8x128xf32>,
      %c0_77 = arith.constant 0 : index
      %c0_78 = arith.constant 0 : index
      %128 = vector.load %arg13[%c0_77, %c0_78] : memref<8x256xf32, #tpu.memory_space<vmem>>, vector<8x256xf32>
      %129 = arith.truncf %128 : vector<8x256xf32> to vector<8x256xbf16>
      %c2_79 = arith.constant 2 : index
      %c0_80 = arith.constant 0 : index
      %c0_81 = arith.constant 0 : index
      %130 = vector.load %arg3[%c2_79, %c0_80, %c0_81] : memref<4x256x512xbf16, #tpu.memory_space<vmem>>, vector<1x256x512xbf16>
      %131 = vector.shape_cast %130 : vector<1x256x512xbf16> to vector<256x512xbf16>
      %cst_82 = arith.constant dense<0.000000e+00> : vector<8x512xf32>
      %132 = tpu.matmul %129, %131, %cst_82 {dimension_numbers = #tpu.dot_dimension_numbers<[1], [0], [0], [1], [0, 0, 1, 1], [], []>} : vector<8x256xbf16>, vector<256x512xbf16>, vector<8x512xf32> -> vector<8x512xf32>
      %c2_83 = arith.constant 2 : index
      %c0_84 = arith.constant 0 : index
      %c0_85 = arith.constant 0 : index
      %133 = vector.load %arg4[%c2_83, %c0_84, %c0_85] : memref<4x1x512xf32, #tpu.memory_space<vmem>>, vector<1x1x512xf32>
      %134 = vector.shape_cast %133 : vector<1x1x512xf32> to vector<1x512xf32>
      %135 = vector.broadcast %134 : vector<1x512xf32> to vector<8x512xf32>
      %136 = arith.addf %132, %135 : vector<8x512xf32>
      %137 = vector.extract_strided_slice %136 {offsets = [0, 0], sizes = [8, 128], strides = [1, 1]} : vector<8x512xf32> to vector<8x128xf32>
      %138 = arith.negf %137 : vector<8x128xf32>
      %139 = math.exp %138 : vector<8x128xf32>
      %cst_86 = arith.constant 1.000000e+00 : f32
      %140 = vector.broadcast %cst_86 : f32 to vector<8x128xf32>
      %141 = arith.addf %140, %139 : vector<8x128xf32>
      %142 = arith.divf %140, %141 : vector<8x128xf32>
      %143 = vector.extract_strided_slice %136 {offsets = [0, 128], sizes = [8, 128], strides = [1, 1]} : vector<8x512xf32> to vector<8x128xf32>
      %144 = arith.negf %143 : vector<8x128xf32>
      %145 = math.exp %144 : vector<8x128xf32>
      %cst_87 = arith.constant 1.000000e+00 : f32
      %146 = vector.broadcast %cst_87 : f32 to vector<8x128xf32>
      %147 = arith.addf %146, %145 : vector<8x128xf32>
      %148 = arith.divf %146, %147 : vector<8x128xf32>
      %149 = vector.extract_strided_slice %136 {offsets = [0, 256], sizes = [8, 128], strides = [1, 1]} : vector<8x512xf32> to vector<8x128xf32>
      %150 = math.tanh %149 : vector<8x128xf32>
      %151 = vector.extract_strided_slice %136 {offsets = [0, 384], sizes = [8, 128], strides = [1, 1]} : vector<8x512xf32> to vector<8x128xf32>
      %152 = arith.negf %151 : vector<8x128xf32>
      %153 = math.exp %152 : vector<8x128xf32>
      %cst_88 = arith.constant 1.000000e+00 : f32
      %154 = vector.broadcast %cst_88 : f32 to vector<8x128xf32>
      %155 = arith.addf %154, %153 : vector<8x128xf32>
      %156 = arith.divf %154, %155 : vector<8x128xf32>
      %c2_89 = arith.constant 2 : index
      %c0_90 = arith.constant 0 : index
      %c0_91 = arith.constant 0 : index
      %157 = vector.load %arg6[%c2_89, %c0_90, %c0_91] : memref<4x8x128xf32, #tpu.memory_space<vmem>>, vector<1x8x128xf32>
      %158 = vector.shape_cast %157 : vector<1x8x128xf32> to vector<8x128xf32>
      %159 = arith.mulf %148, %158 : vector<8x128xf32>
      %160 = arith.mulf %142, %150 : vector<8x128xf32>
      %161 = arith.addf %159, %160 : vector<8x128xf32>
      %162 = math.tanh %161 : vector<8x128xf32>
      %163 = arith.mulf %156, %162 : vector<8x128xf32>
      %c2_92 = arith.constant 2 : index
      %c0_93 = arith.constant 0 : index
      %c0_94 = arith.constant 0 : index
      %164 = vector.load %arg11[%c2_92, %c0_93, %c0_94] : memref<4x8x128xf32, #tpu.memory_space<vmem>>, vector<1x8x128xf32>
      %165 = vector.shape_cast %164 : vector<1x8x128xf32> to vector<8x128xf32>
      %166 = vector.shape_cast %163 : vector<8x128xf32> to vector<1x8x128xf32>
      tpu.vector_store %arg11[%c2_92, %c0_93, %c0_94], %166 {strides = array<i32>} : memref<4x8x128xf32, #tpu.memory_space<vmem>>, vector<1x8x128xf32>,
      %c2_95 = arith.constant 2 : index
      %c0_96 = arith.constant 0 : index
      %c0_97 = arith.constant 0 : index
      %167 = vector.load %arg12[%c2_95, %c0_96, %c0_97] : memref<4x8x128xf32, #tpu.memory_space<vmem>>, vector<1x8x128xf32>
      %168 = vector.shape_cast %167 : vector<1x8x128xf32> to vector<8x128xf32>
      %169 = vector.shape_cast %161 : vector<8x128xf32> to vector<1x8x128xf32>
      tpu.vector_store %arg12[%c2_95, %c0_96, %c0_97], %169 {strides = array<i32>} : memref<4x8x128xf32, #tpu.memory_space<vmem>>, vector<1x8x128xf32>,
      %c0_98 = arith.constant 0 : index
      %c0_99 = arith.constant 0 : index
      %170 = vector.load %arg13[%c0_98, %c0_99] : memref<8x256xf32, #tpu.memory_space<vmem>>, vector<8x128xf32>
      tpu.vector_store %arg13[%c0_98, %c0_99], %163 {strides = array<i32>} : memref<8x256xf32, #tpu.memory_space<vmem>>, vector<8x128xf32>,
      %c3 = arith.constant 3 : index
      %c0_100 = arith.constant 0 : index
      %c0_101 = arith.constant 0 : index
      %171 = vector.load %arg5[%c3, %c0_100, %c0_101] : memref<4x8x128xf32, #tpu.memory_space<vmem>>, vector<1x8x128xf32>
      %172 = vector.shape_cast %171 : vector<1x8x128xf32> to vector<8x128xf32>
      %c0_102 = arith.constant 0 : index
      %c128_103 = arith.constant 128 : index
      %173 = vector.load %arg13[%c0_102, %c128_103] : memref<8x256xf32, #tpu.memory_space<vmem>>, vector<8x128xf32>
      tpu.vector_store %arg13[%c0_102, %c128_103], %172 {strides = array<i32>} : memref<8x256xf32, #tpu.memory_space<vmem>>, vector<8x128xf32>,
      %c0_104 = arith.constant 0 : index
      %c0_105 = arith.constant 0 : index
      %174 = vector.load %arg13[%c0_104, %c0_105] : memref<8x256xf32, #tpu.memory_space<vmem>>, vector<8x256xf32>
      %175 = arith.truncf %174 : vector<8x256xf32> to vector<8x256xbf16>
      %c3_106 = arith.constant 3 : index
      %c0_107 = arith.constant 0 : index
      %c0_108 = arith.constant 0 : index
      %176 = vector.load %arg3[%c3_106, %c0_107, %c0_108] : memref<4x256x512xbf16, #tpu.memory_space<vmem>>, vector<1x256x512xbf16>
      %177 = vector.shape_cast %176 : vector<1x256x512xbf16> to vector<256x512xbf16>
      %cst_109 = arith.constant dense<0.000000e+00> : vector<8x512xf32>
      %178 = tpu.matmul %175, %177, %cst_109 {dimension_numbers = #tpu.dot_dimension_numbers<[1], [0], [0], [1], [0, 0, 1, 1], [], []>} : vector<8x256xbf16>, vector<256x512xbf16>, vector<8x512xf32> -> vector<8x512xf32>
      %c3_110 = arith.constant 3 : index
      %c0_111 = arith.constant 0 : index
      %c0_112 = arith.constant 0 : index
      %179 = vector.load %arg4[%c3_110, %c0_111, %c0_112] : memref<4x1x512xf32, #tpu.memory_space<vmem>>, vector<1x1x512xf32>
      %180 = vector.shape_cast %179 : vector<1x1x512xf32> to vector<1x512xf32>
      %181 = vector.broadcast %180 : vector<1x512xf32> to vector<8x512xf32>
      %182 = arith.addf %178, %181 : vector<8x512xf32>
      %183 = vector.extract_strided_slice %182 {offsets = [0, 0], sizes = [8, 128], strides = [1, 1]} : vector<8x512xf32> to vector<8x128xf32>
      %184 = arith.negf %183 : vector<8x128xf32>
      %185 = math.exp %184 : vector<8x128xf32>
      %cst_113 = arith.constant 1.000000e+00 : f32
      %186 = vector.broadcast %cst_113 : f32 to vector<8x128xf32>
      %187 = arith.addf %186, %185 : vector<8x128xf32>
      %188 = arith.divf %186, %187 : vector<8x128xf32>
      %189 = vector.extract_strided_slice %182 {offsets = [0, 128], sizes = [8, 128], strides = [1, 1]} : vector<8x512xf32> to vector<8x128xf32>
      %190 = arith.negf %189 : vector<8x128xf32>
      %191 = math.exp %190 : vector<8x128xf32>
      %cst_114 = arith.constant 1.000000e+00 : f32
      %192 = vector.broadcast %cst_114 : f32 to vector<8x128xf32>
      %193 = arith.addf %192, %191 : vector<8x128xf32>
      %194 = arith.divf %192, %193 : vector<8x128xf32>
      %195 = vector.extract_strided_slice %182 {offsets = [0, 256], sizes = [8, 128], strides = [1, 1]} : vector<8x512xf32> to vector<8x128xf32>
      %196 = math.tanh %195 : vector<8x128xf32>
      %197 = vector.extract_strided_slice %182 {offsets = [0, 384], sizes = [8, 128], strides = [1, 1]} : vector<8x512xf32> to vector<8x128xf32>
      %198 = arith.negf %197 : vector<8x128xf32>
      %199 = math.exp %198 : vector<8x128xf32>
      %cst_115 = arith.constant 1.000000e+00 : f32
      %200 = vector.broadcast %cst_115 : f32 to vector<8x128xf32>
      %201 = arith.addf %200, %199 : vector<8x128xf32>
      %202 = arith.divf %200, %201 : vector<8x128xf32>
      %c3_116 = arith.constant 3 : index
      %c0_117 = arith.constant 0 : index
      %c0_118 = arith.constant 0 : index
      %203 = vector.load %arg6[%c3_116, %c0_117, %c0_118] : memref<4x8x128xf32, #tpu.memory_space<vmem>>, vector<1x8x128xf32>
      %204 = vector.shape_cast %203 : vector<1x8x128xf32> to vector<8x128xf32>
      %205 = arith.mulf %194, %204 : vector<8x128xf32>
      %206 = arith.mulf %188, %196 : vector<8x128xf32>
      %207 = arith.addf %205, %206 : vector<8x128xf32>
      %208 = math.tanh %207 : vector<8x128xf32>
      %209 = arith.mulf %202, %208 : vector<8x128xf32>
      %c3_119 = arith.constant 3 : index
      %c0_120 = arith.constant 0 : index
      %c0_121 = arith.constant 0 : index
      %210 = vector.load %arg11[%c3_119, %c0_120, %c0_121] : memref<4x8x128xf32, #tpu.memory_space<vmem>>, vector<1x8x128xf32>
      %211 = vector.shape_cast %210 : vector<1x8x128xf32> to vector<8x128xf32>
      %212 = vector.shape_cast %209 : vector<8x128xf32> to vector<1x8x128xf32>
      tpu.vector_store %arg11[%c3_119, %c0_120, %c0_121], %212 {strides = array<i32>} : memref<4x8x128xf32, #tpu.memory_space<vmem>>, vector<1x8x128xf32>,
      %c3_122 = arith.constant 3 : index
      %c0_123 = arith.constant 0 : index
      %c0_124 = arith.constant 0 : index
      %213 = vector.load %arg12[%c3_122, %c0_123, %c0_124] : memref<4x8x128xf32, #tpu.memory_space<vmem>>, vector<1x8x128xf32>
      %214 = vector.shape_cast %213 : vector<1x8x128xf32> to vector<8x128xf32>
      %215 = vector.shape_cast %207 : vector<8x128xf32> to vector<1x8x128xf32>
      tpu.vector_store %arg12[%c3_122, %c0_123, %c0_124], %215 {strides = array<i32>} : memref<4x8x128xf32, #tpu.memory_space<vmem>>, vector<1x8x128xf32>,
      %c0_125 = arith.constant 0 : index
      %c0_126 = arith.constant 0 : index
      %c0_127 = arith.constant 0 : index
      %216 = vector.load %arg7[%c0_125, %c0_126, %c0_127] : memref<8x8x128xf32, #tpu.memory_space<vmem>>, vector<8x8x128xf32>
      %217 = vector.shape_cast %209 : vector<8x128xf32> to vector<8x1x128xf32>
      %218 = vector.broadcast %217 : vector<8x1x128xf32> to vector<8x8x128xf32>
      %219 = arith.mulf %216, %218 : vector<8x8x128xf32>
      %cst_128 = arith.constant dense<0.000000e+00> : vector<8x8xf32>
      %220 = vector.multi_reduction <add>, %219, %cst_128 [2] : vector<8x8x128xf32> to vector<8x8xf32>
      %cst_129 = arith.constant dense<0xFF800000> : vector<8xf32>
      %221 = vector.multi_reduction <maximumf>, %220, %cst_129 [1] : vector<8x8xf32> to vector<8xf32>
      %222 = vector.shape_cast %221 : vector<8xf32> to vector<8x1xf32>
      %223 = vector.broadcast %222 : vector<8x1xf32> to vector<8x8xf32>
      %224 = arith.subf %220, %223 : vector<8x8xf32>
      %225 = math.exp %224 : vector<8x8xf32>
      %cst_130 = arith.constant dense<0.000000e+00> : vector<8xf32>
      %226 = vector.multi_reduction <add>, %225, %cst_130 [1] : vector<8x8xf32> to vector<8xf32>
      %227 = vector.shape_cast %226 : vector<8xf32> to vector<8x1xf32>
      %228 = tpu.reciprocal %227 {approx = true} : vector<8x1xf32> -> vector<8x1xf32>
      %229 = vector.broadcast %228 : vector<8x1xf32> to vector<8x8xf32>
      %230 = arith.mulf %225, %229 : vector<8x8xf32>
      %231 = vector.shape_cast %230 : vector<8x8xf32> to vector<8x8x1xf32>
      %232 = vector.broadcast %231 : vector<8x8x1xf32> to vector<8x8x128xf32>
      %233 = arith.mulf %232, %216 : vector<8x8x128xf32>
      %cst_131 = arith.constant dense<0.000000e+00> : vector<8x128xf32>
      %234 = vector.multi_reduction <add>, %233, %cst_131 [1] : vector<8x8x128xf32> to vector<8x128xf32>
      %c0_132 = arith.constant 0 : index
      %c0_133 = arith.constant 0 : index
      %235 = vector.load %arg13[%c0_132, %c0_133] : memref<8x256xf32, #tpu.memory_space<vmem>>, vector<8x128xf32>
      tpu.vector_store %arg13[%c0_132, %c0_133], %234 {strides = array<i32>} : memref<8x256xf32, #tpu.memory_space<vmem>>, vector<8x128xf32>,
      %c0_134 = arith.constant 0 : index
      %c128_135 = arith.constant 128 : index
      %236 = vector.load %arg13[%c0_134, %c128_135] : memref<8x256xf32, #tpu.memory_space<vmem>>, vector<8x128xf32>
      tpu.vector_store %arg13[%c0_134, %c128_135], %209 {strides = array<i32>} : memref<8x256xf32, #tpu.memory_space<vmem>>, vector<8x128xf32>,
    } else {
    }
    %c0 = arith.constant 0 : index
    %c0_1 = arith.constant 0 : index
    %3 = vector.load %arg13[%c0, %c0_1] : memref<8x256xf32, #tpu.memory_space<vmem>>, vector<8x256xf32>
    %4 = arith.truncf %3 : vector<8x256xf32> to vector<8x256xbf16>
    %c0_2 = arith.constant 0 : index
    %c0_3 = arith.constant 0 : index
    %5 = vector.load %arg8[%c0_2, %c0_3] : memref<256x512xbf16, #tpu.memory_space<vmem>>, vector<256x512xbf16>
    %cst = arith.constant dense<0.000000e+00> : vector<8x512xf32>
    %6 = tpu.matmul %4, %5, %cst {dimension_numbers = #tpu.dot_dimension_numbers<[1], [0], [0], [1], [0, 0, 1, 1], [], []>} : vector<8x256xbf16>, vector<256x512xbf16>, vector<8x512xf32> -> vector<8x512xf32>
    %c0_4 = arith.constant 0 : index
    %c0_5 = arith.constant 0 : index
    %7 = vector.load %arg9[%c0_4, %c0_5] : memref<1x512xf32, #tpu.memory_space<vmem>>, vector<1x512xf32>
    %8 = vector.broadcast %7 : vector<1x512xf32> to vector<8x512xf32>
    %9 = arith.addf %6, %8 : vector<8x512xf32>
    %cst_6 = arith.constant dense<0xFF800000> : vector<8xf32>
    %10 = vector.multi_reduction <maximumf>, %9, %cst_6 [1] : vector<8x512xf32> to vector<8xf32>
    %11 = vector.shape_cast %10 : vector<8xf32> to vector<8x1xf32>
    %12 = vector.broadcast %11 : vector<8x1xf32> to vector<8x512xf32>
    %13 = arith.subf %9, %12 : vector<8x512xf32>
    %14 = math.exp %13 : vector<8x512xf32>
    %cst_7 = arith.constant dense<0.000000e+00> : vector<8xf32>
    %15 = vector.multi_reduction <add>, %14, %cst_7 [1] : vector<8x512xf32> to vector<8xf32>
    %16 = vector.shape_cast %15 : vector<8xf32> to vector<8x1xf32>
    %17 = math.log %16 : vector<8x1xf32>
    %18 = arith.addf %11, %17 : vector<8x1xf32>
    %19 = vector.broadcast %18 : vector<8x1xf32> to vector<8x512xf32>
    %20 = arith.subf %9, %19 : vector<8x512xf32>
    %c0_8 = arith.constant 0 : index
    %c0_9 = arith.constant 0 : index
    %21 = vector.load %arg10[%c0_8, %c0_9] : memref<8x512xf32, #tpu.memory_space<vmem>>, vector<8x512xf32>
    tpu.vector_store %arg10[%c0_8, %c0_9], %20 {strides = array<i32>} : memref<8x512xf32, #tpu.memory_space<vmem>>, vector<8x512xf32>,
    return
  }
  func.func @transform_0(%arg0: i32) -> (i32, i32) {
    %c0_i32 = arith.constant 0 : i32
    %c0_i32_0 = arith.constant 0 : i32
    %c0_i32_1 = arith.constant 0 : i32
    return %c0_i32, %c0_i32_0 : i32, i32
  }
  func.func @transform_1(%arg0: i32) -> (i32, i32) {
    %c0_i32 = arith.constant 0 : i32
    %c0_i32_0 = arith.constant 0 : i32
    %c0_i32_1 = arith.constant 0 : i32
    return %c0_i32, %c0_i32_0 : i32, i32
  }
  func.func @transform_2(%arg0: i32) -> (i32, i32, i32) {
    %c0_i32 = arith.constant 0 : i32
    %c0_i32_0 = arith.constant 0 : i32
    %c0_i32_1 = arith.constant 0 : i32
    %c0_i32_2 = arith.constant 0 : i32
    return %c0_i32, %c0_i32_0, %c0_i32_1 : i32, i32, i32
  }
  func.func @transform_3(%arg0: i32) -> (i32, i32, i32) {
    %c0_i32 = arith.constant 0 : i32
    %c0_i32_0 = arith.constant 0 : i32
    %c0_i32_1 = arith.constant 0 : i32
    %c0_i32_2 = arith.constant 0 : i32
    return %c0_i32, %c0_i32_0, %c0_i32_1 : i32, i32, i32
  }
  func.func @transform_4(%arg0: i32) -> (i32, i32, i32) {
    %c0_i32 = arith.constant 0 : i32
    %c0_i32_0 = arith.constant 0 : i32
    %c0_i32_1 = arith.constant 0 : i32
    %c0_i32_2 = arith.constant 0 : i32
    return %c0_i32, %c0_i32_0, %c0_i32_1 : i32, i32, i32
  }
  func.func @transform_5(%arg0: i32) -> (i32, i32, i32) {
    %c0_i32 = arith.constant 0 : i32
    %c0_i32_0 = arith.constant 0 : i32
    %c0_i32_1 = arith.constant 0 : i32
    %c0_i32_2 = arith.constant 0 : i32
    return %c0_i32, %c0_i32_0, %c0_i32_1 : i32, i32, i32
  }
  func.func @transform_6(%arg0: i32) -> (i32, i32, i32) {
    %c0_i32 = arith.constant 0 : i32
    %c0_i32_0 = arith.constant 0 : i32
    %c0_i32_1 = arith.constant 0 : i32
    %c0_i32_2 = arith.constant 0 : i32
    return %c0_i32, %c0_i32_0, %c0_i32_1 : i32, i32, i32
  }
  func.func @transform_7(%arg0: i32) -> (i32, i32) {
    %c0_i32 = arith.constant 0 : i32
    %c0_i32_0 = arith.constant 0 : i32
    return %c0_i32, %arg0 : i32, i32
  }
  func.func @transform_8(%arg0: i32) -> (i32, i32) {
    %c0_i32 = arith.constant 0 : i32
    %c0_i32_0 = arith.constant 0 : i32
    return %c0_i32, %arg0 : i32, i32
  }
  func.func @transform_9(%arg0: i32) -> (i32, i32) {
    %c0_i32 = arith.constant 0 : i32
    %c0_i32_0 = arith.constant 0 : i32
    %c0_i32_1 = arith.constant 0 : i32
    return %c0_i32, %c0_i32_0 : i32, i32
  }
  func.func @transform_10(%arg0: i32) -> (i32, i32, i32) {
    %c0_i32 = arith.constant 0 : i32
    %c0_i32_0 = arith.constant 0 : i32
    %c0_i32_1 = arith.constant 0 : i32
    %c0_i32_2 = arith.constant 0 : i32
    return %c0_i32, %c0_i32_0, %c0_i32_1 : i32, i32, i32
  }
  func.func @transform_11(%arg0: i32) -> (i32, i32, i32) {
    %c0_i32 = arith.constant 0 : i32
    %c0_i32_0 = arith.constant 0 : i32
    %c0_i32_1 = arith.constant 0 : i32
    %c0_i32_2 = arith.constant 0 : i32
    return %c0_i32, %c0_i32_0, %c0_i32_1 : i32, i32, i32
  }
}

</mosaic_0001>

<bundles_post_ra>
// kernel: tpu_custom_call.1
= control target key start
LH: loop header
LB: loop body
LE: loop exit
PB: predicated region body
PF: predicated region fallthrough
CT: control target
= control target key end

     0   :  { %17 = vsyncpa [#allocation4], 0  ;;  %s5210_s0 = inlined_call_operand.vmem [shape: s32[8,1], index: 0, kind: input, shape index: {}]   ;;  %s5211_s1 = inlined_call_operand.hbm [shape: bf16[512,128], index: 1, kind: input, shape index: {}]   ;;  %s5212_s2 = inlined_call_operand.hbm [shape: bf16[4,256,512], index: 2, kind: input, shape index: {}]   ;;  %s5213_s3 = inlined_call_operand.vmem [shape: f32[4,1,512], index: 3, kind: input, shape index: {}]   ;;  %s5214_s4 = inlined_call_operand.hbm [shape: f32[4,8,128], index: 4, kind: input, shape index: {}, may-alias: {4,10}]   ;;  %s5215_s5 = inlined_call_operand.hbm [shape: f32[4,8,128], index: 5, kind: input, shape index: {}, may-alias: {5,11}]   ;;  %s5216_s6 = inlined_call_operand.vmem [shape: f32[8,8,128], index: 6, kind: input, shape index: {}]   ;;  %s5217_s7 = inlined_call_operand.hbm [shape: bf16[256,512], index: 7, kind: input, shape index: {}]   ;;  %s5218_s8 = inlined_call_operand.vmem [shape: f32[1,512], index: 8, kind: input, shape index: {}]   ;;  %s5219_s9 = inlined_call_operand.hbm [shape: f32[8,512], index: 9, kind: output, shape index: {0}]   ;;  %s5220_s10 = inlined_call_operand.hbm [shape: f32[4,8,128], index: 10, kind: output, shape index: {1}, may-alias: {4,10}]   ;;  %s5221_s11 = inlined_call_operand.hbm [shape: f32[4,8,128], index: 11, kind: output, shape index: {2}, may-alias: {5,11}]  }
   0x1   :  { %18 = vsyncpa [#allocation7], 0 }
   0x2   :  { %19 = vsyncpa [#allocation10], 0 }
   0x3   :  { %20 = vsyncpa [#allocation5], 0 }
   0x4   :  { %21 = vsyncpa [#allocation14], 0  ;;  %s4843_s17 = smov [#allocation6]  }
   0x5   :  { %s41_s18 = sshll.u32 %s4843_s17, 4  ;;  %s42_s18 = int_to_ptr.vmem [resolvable:$true] %s41_s18 }
   0x6   :  { %s4681_s19 = scalar_lea.vmem %s42_s18, 32768  ;;  %p4686_p1 = scmp.lt.s32.totalorder %s42_s18, %s42_s18 }
   0x7   :  { %p4682_p0 = scmp.ne.s32.totalorder %s42_s18, %s4681_s19  ;;  %p4687_p2 = scmp.lt.s32.totalorder %s4681_s19, %s4681_s19 }
   0x9   :  { %p4688_p3 = por %p4687_p2, %p4686_p1 }
   0xb   :  { %p4689_p4 = pnand %p4688_p3, %p4682_p0 }
   0xd   :  { %4692 = shalt.err (!%p4689_p4)
}
   0xe   :  { %s4844_s20 = smov 256   ;;  %s4845_s21 = smov 16  }
   0xf   :  { %47 = dma.hbm_to_vmem [thread:$0]  %s5212_s2, 32768, %s42_s18, [#allocation7], %s4844_s20, %s4844_s20, %s4845_s21  }
  0x10   :  { %s4846_s24 = smov [#allocation9]   ;;  %s4847_s26 = smov [#allocation3]  }
  0x11   :  { %s67_s25 = sshll.u32 %s4846_s24, 4  ;;  %s29_s27 = sshll.u32 %s4847_s26, 4  ;;  %s68_s25 = int_to_ptr.vmem [resolvable:$true] %s67_s25  ;;  %s30_s27 = int_to_ptr.vmem [resolvable:$true] %s29_s27 }
  0x12   :  { %s4701_s28 = scalar_lea.vmem %s68_s25, 512  ;;  %p4706_p6 = scmp.lt.s32.totalorder %s68_s25, %s68_s25 }
  0x13   :  { %p4702_p5 = scmp.ne.s32.totalorder %s68_s25, %s4701_s28  ;;  %p4707_p7 = scmp.lt.s32.totalorder %s4701_s28, %s4701_s28 }
  0x15   :  { %p4708_p8 = por %p4707_p7, %p4706_p6 }
  0x17   :  { %p4709_p9 = pnand %p4708_p8, %p4702_p5 }
  0x19   :  { %4712 = shalt.err (!%p4709_p9)
}
  0x1a   :  { %s4848_s29 = smov 128   ;;  %s4849_s30 = smov 8  }
  0x1b   :  { %73 = dma.hbm_to_vmem [thread:$0]  %s5215_s5, 512, %s68_s25, [#allocation10], %s4848_s29, %s4848_s29, %s4849_s30  }
  0x1c   :  { %s4721_s2 = scalar_lea.vmem %s30_s27, 4096  ;;  %p4726_p11 = scmp.lt.s32.totalorder %s30_s27, %s30_s27 }
  0x1d   :  { %p4722_p10 = scmp.ne.s32.totalorder %s30_s27, %s4721_s2  ;;  %p4727_p12 = scmp.lt.s32.totalorder %s4721_s2, %s4721_s2 }
  0x1f   :  { %p4728_p13 = por %p4727_p12, %p4726_p11 }
  0x21   :  { %p4729_p0 = pnand %p4728_p13, %p4722_p10 }
  0x23   :  { %4732 = shalt.err (!%p4729_p0)
}
  0x24   :  { %s4850_s14 = smov 64   ;;  %s4851_s15 = smov 4  }
  0x25   :  { %35 = dma.hbm_to_vmem [thread:$0]  %s5211_s1, 4096, %s30_s27, [#allocation4], %s4850_s14, %s4850_s14, %s4851_s15  }
  0x26   :  { %s4852_s18 = smov [#allocation8]   ;;  %s4853_s22 = smov [#allocation11]  }
  0x27   :  { %s55_s19 = sshll.u32 %s4852_s18, 4  ;;  %s81_s23 = sshll.u32 %s4853_s22, 4  ;;  %s56_s19 = int_to_ptr.vmem [resolvable:$true] %s55_s19  ;;  %s82_s23 = int_to_ptr.vmem [resolvable:$true] %s81_s23 }
  0x28   :  { %s4741_s5 = scalar_lea.vmem %s56_s19, 512  ;;  %p4746_p2 = scmp.lt.s32.totalorder %s56_s19, %s56_s19 }
  0x29   :  { %p4742_p1 = scmp.ne.s32.totalorder %s56_s19, %s4741_s5  ;;  %p4747_p3 = scmp.lt.s32.totalorder %s4741_s5, %s4741_s5 }
  0x2b   :  { %p4748_p4 = por %p4747_p3, %p4746_p2 }
  0x2d   :  { %p4749_p5 = pnand %p4748_p4, %p4742_p1 }
  0x2f   :  { %4752 = shalt.err (!%p4749_p5)
}
  0x30   :  { %61 = dma.hbm_to_vmem [thread:$0]  %s5214_s4, 512, %s56_s19, [#allocation7], %s4848_s29, %s4848_s29, %s4849_s30  }
  0x31   :  { %s4761_s1 = scalar_lea.vmem %s82_s23, 8192  ;;  %p4766_p7 = scmp.lt.s32.totalorder %s82_s23, %s82_s23 }
  0x32   :  { %p4762_p6 = scmp.ne.s32.totalorder %s82_s23, %s4761_s1  ;;  %p4767_p8 = scmp.lt.s32.totalorder %s4761_s1, %s4761_s1 }
  0x34   :  { %p4768_p9 = por %p4767_p8, %p4766_p7 }
  0x36   :  { %p4769_p10 = pnand %p4768_p9, %p4762_p6 }
  0x38   :  { %4772 = shalt.err (!%p4769_p10)
}
  0x39   :  { %87 = dma.hbm_to_vmem [thread:$0]  %s5217_s7, 8192, %s82_s23, [#allocation10], %s4844_s20, %s4844_s20, %s4845_s21  }
  0x3a   :  { %4833 = dma.done.wait [#allocation4], 4096  }
  0x3b   :  { %4834 = vsyncadd [#allocation4], 4294963200 }
  0x3c   :  { %4835 = dma.done.wait [#allocation7], 33280  }
  0x3d   :  { %4836 = vsyncadd [#allocation7], 4294934016 }
  0x3e   :  { %4837 = dma.done.wait [#allocation10], 8704  }
  0x3f   :  { %4838 = vsyncadd [#allocation10], 4294958592  ;;  %v4854_v0 = vmov 0   ;;  %v115_v1 = vld [vmem:[%s5210_s0] sm:$0xff]  ;;  %v4069_v2 = vld [vmem:[#allocation3 + $0x78] sm:$0xff]   ;;  %v110_v36 = vlaneseq  ;;  %vm2735_vm8 = vcmask 1041409  }
  0x40   :  { %4067 = vset.pattern.permute.xlu0 %v4854_v0  ;;  %4068 = vset.pattern.permute.xlu1 %v4854_v0  ;;  %v4070_v3 = vld [vmem:[#allocation3 + $0xf8] sm:$0xff]   ;;  %v4073_v6 = vld [vmem:[#allocation3 + $0x70] sm:$0xff]   ;;  %v4077_v10 = vld [vmem:[#allocation3 + $0x68] sm:$0xff]   ;;  %v4855_v46 = vmov 1.0|1.0   ;;  %vm2737_vm9 = vcmask 1042434  }
  0x41   :  { %117 = vperm.xlu0 %4067, %v115_v1   ;;  %4006 = vmatprep.subr.bf16.mxu0 %v4069_v2  ;;  %v4071_v4 = vld [vmem:[#allocation3 + $0x38] sm:$0xff]   ;;  %v4074_v7 = vld [vmem:[#allocation3 + $0xf0] sm:$0xff]   ;;  %v4078_v11 = vld [vmem:[#allocation3 + $0xe8] sm:$0xff]   ;;  %v4951_v37 = vand.u32 127, %v110_v36  ;;  %vm2739_vm10 = vcmask 1043459   ;;  %vm2741_vm11 = vcmask 1044484  }
  0x42   :  { %4028 = vmatprep.subr.bf16.mxu1 %v4070_v3  ;;  %v4072_v5 = vld [vmem:[#allocation3 + $0xb8] sm:$0xff]   ;;  %4007 = vmatpush3.bf16.msra.mxu0 %v4071_v4  ;;  %v4075_v8 = vld [vmem:[#allocation3 + $0x30] sm:$0xff]   ;;  %v4079_v12 = vld [vmem:[#allocation3 + $0x28] sm:$0xff]   ;;  %vm2743_vm12 = vcmask 1045509   ;;  %vm2745_vm13 = vcmask 1046534   ;;  %vm2747_vm14 = vcmask 1047559  }
  0x43   :  { %4029 = vmatpush3.bf16.msra.mxu1 %v4072_v5  ;;  %4008 = vmatprep.subr.bf16.mxu0 %v4073_v6  ;;  %v4076_v9 = vld [vmem:[#allocation3 + $0xb0] sm:$0xff]   ;;  %v4080_v13 = vld [vmem:[#allocation3 + $0xa8] sm:$0xff]   ;;  %v4081_v14 = vld [vmem:[#allocation3 + $0x60] sm:$0xff]   ;;  %v112_v38 = vadd.s32 128, %v4951_v37  ;;  %v114_v39 = vadd.s32 384, %v4951_v37  ;;  %v113_v40 = vadd.s32 256, %v4951_v37 }
  0x44   :  { %4030 = vmatprep.subr.bf16.mxu1 %v4074_v7  ;;  %v4082_v15 = vld [vmem:[#allocation3 + $0xe0] sm:$0xff]   ;;  %v4085_v18 = vld [vmem:[#allocation3 + $0x58] sm:$0xff]   ;;  %v4089_v22 = vld [vmem:[#allocation3 + $0x50] sm:$0xff]   ;;  %vm2750_vm15 = vcmask 64512  }
  0x45   :  { %v4083_v16 = vld [vmem:[#allocation3 + $0x20] sm:$0xff]   ;;  %v4086_v19 = vld [vmem:[#allocation3 + $0xd8] sm:$0xff]   ;;  %v4090_v23 = vld [vmem:[#allocation3 + $0xd0] sm:$0xff]  }
  0x46   :  { %4009 = vmatpush3.bf16.msra.mxu0 %v4075_v8  ;;  %v4084_v17 = vld [vmem:[#allocation3 + $0xa0] sm:$0xff]   ;;  %v4087_v20 = vld [vmem:[#allocation3 + $0x18] sm:$0xff]   ;;  %v4091_v24 = vld [vmem:[#allocation3 + $0x10] sm:$0xff]  }
  0x47   :  { %4031 = vmatpush3.bf16.msra.mxu1 %v4076_v9  ;;  %4010 = vmatprep.subr.bf16.mxu0 %v4077_v10  ;;  %v4088_v21 = vld [vmem:[#allocation3 + $0x98] sm:$0xff]   ;;  %v4092_v25 = vld [vmem:[#allocation3 + $0x90] sm:$0xff]   ;;  %v4093_v26 = vld [vmem:[#allocation3 + $0x48] sm:$0xff]  }
  0x48   :  { %4032 = vmatprep.subr.bf16.mxu1 %v4078_v11  ;;  %v4094_v27 = vld [vmem:[#allocation3 + $0xc8] sm:$0xff]   ;;  %v4097_v30 = vld [vmem:[#allocation3 + $0x40] sm:$0xff]  }
  0x49   :  { %v4095_v28 = vld [vmem:[#allocation3 + $0x8] sm:$0xff]   ;;  %v4098_v31 = vld [vmem:[#allocation3 + $0xc0] sm:$0xff]  }
  0x4a   :  { %4011 = vmatpush3.bf16.msra.mxu0 %v4079_v12  ;;  %v4096_v29 = vld [vmem:[#allocation3 + $0x88] sm:$0xff]   ;;  %v4099_v32 = vld [vmem:[#allocation3] sm:$0xff]  }
  0x4b   :  { %4033 = vmatpush3.bf16.msra.mxu1 %v4080_v13  ;;  %4012 = vmatprep.subr.bf16.mxu0 %v4081_v14  ;;  %v4100_v33 = vld [vmem:[#allocation3 + $0x80] sm:$0xff]   ;;  %v4106_v35 = vld [vmem:[#allocation6 + $0xec] ss:$16 sps:$4 sm:$0xff]   ;;  %v4104_v43 = vld [vmem:[#allocation6 + $0xe8] ss:$16 sps:$4 sm:$0xff]  }
  0x4c   :  { %4034 = vmatprep.subr.bf16.mxu1 %v4082_v15  ;;  %v4103_v34 = vld [vmem:[#allocation6 + $0xe4] ss:$16 sps:$4 sm:$0xff]   ;;  %v4101_v42 = vld [vmem:[#allocation6 + $0xe0] ss:$16 sps:$4 sm:$0xff]   ;;  %v4112_v45 = vld [vmem:[#allocation6 + $0xcc] ss:$16 sps:$4 sm:$0xff]  }
  0x4d   :  { %v4109_v44 = vld [vmem:[#allocation6 + $0xc4] ss:$16 sps:$4 sm:$0xff]   ;;  %v4107_v47 = vld [vmem:[#allocation6 + $0xc0] ss:$16 sps:$4 sm:$0xff]   ;;  %v4110_v48 = vld [vmem:[#allocation6 + $0xc8] ss:$16 sps:$4 sm:$0xff]  }
  0x4e   :  { %4013 = vmatpush3.bf16.msra.mxu0 %v4083_v16  ;;  %v4115_v49 = vld [vmem:[#allocation6 + $0xa4] ss:$16 sps:$4 sm:$0xff]   ;;  %v4118_v50 = vld [vmem:[#allocation6 + $0xac] ss:$16 sps:$4 sm:$0xff]   ;;  %v4113_v51 = vld [vmem:[#allocation6 + $0xa0] ss:$16 sps:$4 sm:$0xff]  }
  0x4f   :  { %4035 = vmatpush3.bf16.msra.mxu1 %v4084_v17  ;;  %4014 = vmatprep.subr.bf16.mxu0 %v4085_v18  ;;  %v4116_v52 = vld [vmem:[#allocation6 + $0xa8] ss:$16 sps:$4 sm:$0xff]   ;;  %v4121_v53 = vld [vmem:[#allocation6 + $0x84] ss:$16 sps:$4 sm:$0xff]   ;;  %v4124_v54 = vld [vmem:[#allocation6 + $0x8c] ss:$16 sps:$4 sm:$0xff]  }
  0x50   :  { %4036 = vmatprep.subr.bf16.mxu1 %v4086_v19  ;;  %v4119_v55 = vld [vmem:[#allocation6 + $0x80] ss:$16 sps:$4 sm:$0xff]   ;;  %v4122_v56 = vld [vmem:[#allocation6 + $0x88] ss:$16 sps:$4 sm:$0xff]   ;;  %v4127_v57 = vld [vmem:[#allocation6 + $0x64] ss:$16 sps:$4 sm:$0xff]  }
  0x51   :  { %v4130_v58 = vld [vmem:[#allocation6 + $0x6c] ss:$16 sps:$4 sm:$0xff]   ;;  %v4125_v59 = vld [vmem:[#allocation6 + $0x60] ss:$16 sps:$4 sm:$0xff]   ;;  %v4128_v60 = vld [vmem:[#allocation6 + $0x68] ss:$16 sps:$4 sm:$0xff]  }
  0x52   :  { %4015 = vmatpush3.bf16.msra.mxu0 %v4087_v20  ;;  %v4133_v61 = vld [vmem:[#allocation6 + $0x44] ss:$16 sps:$4 sm:$0xff]   ;;  %v4136_v62 = vld [vmem:[#allocation6 + $0x4c] ss:$16 sps:$4 sm:$0xff]   ;;  %v4131_v63 = vld [vmem:[#allocation6 + $0x40] ss:$16 sps:$4 sm:$0xff]  }
  0x53   :  { %4037 = vmatpush3.bf16.msra.mxu1 %v4088_v21  ;;  %4016 = vmatprep.subr.bf16.mxu0 %v4089_v22  ;;  %v4134_v0 = vld [vmem:[#allocation6 + $0x48] ss:$16 sps:$4 sm:$0xff]   ;;  %v4139_v1 = vld [vmem:[#allocation6 + $0x24] ss:$16 sps:$4 sm:$0xff]   ;;  %v4142_v2 = vld [vmem:[#allocation6 + $0x2c] ss:$16 sps:$4 sm:$0xff]  }
  0x54   :  { %4038 = vmatprep.subr.bf16.mxu1 %v4090_v23  ;;  %v4137_v3 = vld [vmem:[#allocation6 + $0x20] ss:$16 sps:$4 sm:$0xff]   ;;  %v4140_v4 = vld [vmem:[#allocation6 + $0x28] ss:$16 sps:$4 sm:$0xff]   ;;  %v4145_v5 = vld [vmem:[#allocation6 + $0x4] ss:$16 sps:$4 sm:$0xff]  }
  0x55   :  { %v4148_v6 = vld [vmem:[#allocation6 + $0xc] ss:$16 sps:$4 sm:$0xff]   ;;  %v4143_v7 = vld [vmem:[#allocation6] ss:$16 sps:$4 sm:$0xff]   ;;  %v4146_v8 = vld [vmem:[#allocation6 + $0x8] ss:$16 sps:$4 sm:$0xff]  }
  0x56   :  { %4017 = vmatpush3.bf16.msra.mxu0 %v4091_v24  ;;  %v4151_v9 = vld [vmem:[#allocation6 + $0x1e4] ss:$16 sps:$4 sm:$0xff]   ;;  %v4154_v10 = vld [vmem:[#allocation6 + $0x1ec] ss:$16 sps:$4 sm:$0xff]   ;;  %v4149_v11 = vld [vmem:[#allocation6 + $0x1e0] ss:$16 sps:$4 sm:$0xff]  }
  0x57   :  { %4039 = vmatpush3.bf16.msra.mxu1 %v4092_v25  ;;  %4018 = vmatprep.subr.bf16.mxu0 %v4093_v26  ;;  %v4152_v12 = vld [vmem:[#allocation6 + $0x1e8] ss:$16 sps:$4 sm:$0xff]   ;;  %v4157_v13 = vld [vmem:[#allocation6 + $0x1c4] ss:$16 sps:$4 sm:$0xff]   ;;  %v4160_v14 = vld [vmem:[#allocation6 + $0x1cc] ss:$16 sps:$4 sm:$0xff]  }
  0x58   :  { %4040 = vmatprep.subr.bf16.mxu1 %v4094_v27  ;;  %v4155_v15 = vld [vmem:[#allocation6 + $0x1c0] ss:$16 sps:$4 sm:$0xff]   ;;  %v4158_v16 = vld [vmem:[#allocation6 + $0x1c8] ss:$16 sps:$4 sm:$0xff]   ;;  %v4163_v17 = vld [vmem:[#allocation6 + $0x1a4] ss:$16 sps:$4 sm:$0xff]  }
  0x59   :  { %v4166_v18 = vld [vmem:[#allocation6 + $0x1ac] ss:$16 sps:$4 sm:$0xff]   ;;  %v4161_v19 = vld [vmem:[#allocation6 + $0x1a0] ss:$16 sps:$4 sm:$0xff]   ;;  %v4164_v20 = vld [vmem:[#allocation6 + $0x1a8] ss:$16 sps:$4 sm:$0xff]  }
  0x5a   :  { %4019 = vmatpush3.bf16.msra.mxu0 %v4095_v28  ;;  %v4169_v21 = vld [vmem:[#allocation6 + $0x184] ss:$16 sps:$4 sm:$0xff]   ;;  %v4172_v22 = vld [vmem:[#allocation6 + $0x18c] ss:$16 sps:$4 sm:$0xff]   ;;  %v4167_v23 = vld [vmem:[#allocation6 + $0x180] ss:$16 sps:$4 sm:$0xff]  }
  0x5b   :  { %4041 = vmatpush3.bf16.msra.mxu1 %v4096_v29  ;;  %4020 = vmatprep.subr.bf16.mxu0 %v4097_v30  ;;  %v4170_v24 = vld [vmem:[#allocation6 + $0x188] ss:$16 sps:$4 sm:$0xff]   ;;  %v4175_v25 = vld [vmem:[#allocation6 + $0x164] ss:$16 sps:$4 sm:$0xff]   ;;  %v4178_v26 = vld [vmem:[#allocation6 + $0x16c] ss:$16 sps:$4 sm:$0xff]  }
  0x5c   :  { %4042 = vmatprep.subr.bf16.mxu1 %v4098_v31  ;;  %v4173_v27 = vld [vmem:[#allocation6 + $0x160] ss:$16 sps:$4 sm:$0xff]   ;;  %v4176_v28 = vld [vmem:[#allocation6 + $0x168] ss:$16 sps:$4 sm:$0xff]   ;;  %v4181_v29 = vld [vmem:[#allocation6 + $0x144] ss:$16 sps:$4 sm:$0xff]  }
  0x5d   :  { %v4184_v30 = vld [vmem:[#allocation6 + $0x14c] ss:$16 sps:$4 sm:$0xff]   ;;  %v4179_v31 = vld [vmem:[#allocation6 + $0x140] ss:$16 sps:$4 sm:$0xff]  }
  0x5e   :  { %4021 = vmatpush3.bf16.msra.mxu0 %v4099_v32  ;;  %v4182_v32 = vld [vmem:[#allocation6 + $0x148] ss:$16 sps:$4 sm:$0xff]  }
  0x5f   :  { %4043 = vmatpush3.bf16.msra.mxu1 %v4100_v33  ;;  %880 = vmatprep.subr.bf16.mxu0 %v4103_v34  ;;  %v4185_v33 = vld [vmem:[#allocation6 + $0x120] ss:$16 sps:$4 sm:$0xff]   ;;  %v4187_v34 = vld [vmem:[#allocation6 + $0x124] ss:$16 sps:$4 sm:$0xff]  }
  0x60   :  { %921 = vmatprep.subr.bf16.mxu1 %v4106_v35  ;;  %v4188_v35 = vld [vmem:[#allocation6 + $0x128] ss:$16 sps:$4 sm:$0xff]  }
  0xbc   :  { %v118_v41 = vpop.permute.xlu0 %117 }
  0xbd   :  { %vm120_vm0 = vcmp.eq.s32.totalorder %v112_v38, %v118_v41  ;;  %vm122_vm1 = vcmp.eq.s32.totalorder %v114_v39, %v118_v41  ;;  %vm119_vm2 = vcmp.eq.s32.totalorder %v4951_v37, %v118_v41  ;;  %vm121_vm4 = vcmp.eq.s32.totalorder %v113_v40, %v118_v41  ;;  %v4190_v38 = vld [vmem:[#allocation6 + $0x12c] ss:$16 sps:$4 sm:$0xff]   ;;  %v4193_v39 = vld [vmem:[#allocation6 + $0x104] ss:$16 sps:$4 sm:$0xff]   ;;  %v4191_v41 = vld [vmem:[#allocation6 + $0x100] ss:$16 sps:$4 sm:$0xff]  }
  0xbe   :  { %vm3663_vm3 = vmpackc.low %vm120_vm0, %vm120_vm0  ;;  %v4196_v40 = vld [vmem:[#allocation6 + $0x10c] ss:$16 sps:$4 sm:$0xff]  }
  0xbf   :  { %3664 = vmatprep.mubr.msk.bf16.mxu0 %vm3663_vm3, %v4855_v46  ;;  %vm3667_vm5 = vmpackc.low %vm122_vm1, %vm122_vm1 }
  0xc0   :  { %3668 = vmatprep.mubr.msk.bf16.mxu1 %vm3667_vm5, %v4855_v46  ;;  %vm3665_vm6 = vmpackc.low %vm119_vm2, %vm119_vm2 }
  0xc1   :  { %3666 = vmatmul.mubr.msk.bf16.vlgmr.msra.gmra.mxu0 %vm3665_vm6, %v4855_v46  ;;  %vm3669_vm7 = vmpackc.low %vm121_vm4, %vm121_vm4 }
  0xc2   :  { %3670 = vmatmul.mubr.msk.bf16.vlgmr.msra.gmra.mxu1 %vm3669_vm7, %v4855_v46  ;;  %881 = vmatpush1.bf16.msra.mxu0 %v4101_v42  ;;  %v4194_v42 = vld [vmem:[#allocation6 + $0x108] ss:$16 sps:$4 sm:$0xff]   ;;  %v4202_v46 = vld [vmem:[#allocation6 + $0x2ec] ss:$16 sps:$4 sm:$0xff]  }
  0xc3   :  { %922 = vmatpush1.bf16.msra.mxu1 %v4104_v43  ;;  %882 = vmatprep.subr.bf16.mxu0 %v4109_v44  ;;  %v468_v43 = vld [vmem:[#allocation8] sm:$0xff] }
  0xc4   :  { %923 = vmatprep.subr.bf16.mxu1 %v4112_v45  ;;  %v473_v44 = vpack.c.bf16 %v468_v43, %v468_v43  ;;  %v4199_v45 = vld [vmem:[#allocation6 + $0x2e4] ss:$16 sps:$4 sm:$0xff]   ;;  %v4269_v43 = vld [vmem:[#allocation6 + $0x360] ss:$16 sps:$4 sm:$0xff]  }
  0xc6   :  { %883 = vmatpush1.bf16.msra.mxu0 %v4107_v47  ;;  %912 = vmatprep.mubr.bf16.mxu0 %v473_v44 }
  0xc7   :  { %924 = vmatpush1.bf16.msra.mxu1 %v4110_v48  ;;  %884 = vmatprep.subr.bf16.mxu0 %v4115_v49 }
  0xc8   :  { %925 = vmatprep.subr.bf16.mxu1 %v4118_v50  ;;  %953 = vmatprep.mubr.bf16.mxu1 %v473_v44  ;;  %v4271_v44 = vld [vmem:[#allocation6 + $0x364] ss:$16 sps:$4 sm:$0xff]  }
  0xca   :  { %885 = vmatpush1.bf16.msra.mxu0 %v4113_v51 }
  0xcb   :  { %926 = vmatpush1.bf16.msra.mxu1 %v4116_v52  ;;  %886 = vmatprep.subr.bf16.mxu0 %v4121_v53 }
  0xcc   :  { %927 = vmatprep.subr.bf16.mxu1 %v4124_v54 }
  0xce   :  { %887 = vmatpush1.bf16.msra.mxu0 %v4119_v55 }
  0xcf   :  { %928 = vmatpush1.bf16.msra.mxu1 %v4122_v56  ;;  %888 = vmatprep.subr.bf16.mxu0 %v4127_v57 }
  0xd0   :  { %929 = vmatprep.subr.bf16.mxu1 %v4130_v58  ;;  %v4197_v58 = vld [vmem:[#allocation6 + $0x2e0] ss:$16 sps:$4 sm:$0xff]  }
  0xd2   :  { %889 = vmatpush1.bf16.msra.mxu0 %v4125_v59  ;;  %v4200_v59 = vld [vmem:[#allocation6 + $0x2e8] ss:$16 sps:$4 sm:$0xff]  }
  0xd3   :  { %930 = vmatpush1.bf16.msra.mxu1 %v4128_v60  ;;  %890 = vmatprep.subr.bf16.mxu0 %v4133_v61  ;;  %v4205_v61 = vld [vmem:[#allocation6 + $0x2c4] ss:$16 sps:$4 sm:$0xff]  }
  0xd4   :  { %931 = vmatprep.subr.bf16.mxu1 %v4136_v62  ;;  %v4208_v62 = vld [vmem:[#allocation6 + $0x2cc] ss:$16 sps:$4 sm:$0xff]  }
  0xd6   :  { %891 = vmatpush1.bf16.msra.mxu0 %v4131_v63  ;;  %v4203_v63 = vld [vmem:[#allocation6 + $0x2c0] ss:$16 sps:$4 sm:$0xff]  }
  0xd7   :  { %932 = vmatpush1.bf16.msra.mxu1 %v4134_v0  ;;  %892 = vmatprep.subr.bf16.mxu0 %v4139_v1  ;;  %v4206_v0 = vld [vmem:[#allocation6 + $0x2c8] ss:$16 sps:$4 sm:$0xff]   ;;  %v4211_v1 = vld [vmem:[#allocation6 + $0x2a4] ss:$16 sps:$4 sm:$0xff]  }
  0xd8   :  { %933 = vmatprep.subr.bf16.mxu1 %v4142_v2  ;;  %v4214_v2 = vld [vmem:[#allocation6 + $0x2ac] ss:$16 sps:$4 sm:$0xff]  }
  0xda   :  { %893 = vmatpush1.bf16.msra.mxu0 %v4137_v3  ;;  %v4209_v3 = vld [vmem:[#allocation6 + $0x2a0] ss:$16 sps:$4 sm:$0xff]  }
  0xdb   :  { %934 = vmatpush1.bf16.msra.mxu1 %v4140_v4  ;;  %894 = vmatprep.subr.bf16.mxu0 %v4145_v5  ;;  %v4212_v4 = vld [vmem:[#allocation6 + $0x2a8] ss:$16 sps:$4 sm:$0xff]   ;;  %v4217_v5 = vld [vmem:[#allocation6 + $0x284] ss:$16 sps:$4 sm:$0xff]  }
  0xdc   :  { %935 = vmatprep.subr.bf16.mxu1 %v4148_v6  ;;  %v4220_v6 = vld [vmem:[#allocation6 + $0x28c] ss:$16 sps:$4 sm:$0xff]  }
  0xde   :  { %895 = vmatpush1.bf16.msra.mxu0 %v4143_v7  ;;  %v4215_v7 = vld [vmem:[#allocation6 + $0x280] ss:$16 sps:$4 sm:$0xff]  }
  0xdf   :  { %936 = vmatpush1.bf16.msra.mxu1 %v4146_v8  ;;  %896 = vmatprep.subr.bf16.mxu0 %v4151_v9  ;;  %v4218_v8 = vld [vmem:[#allocation6 + $0x288] ss:$16 sps:$4 sm:$0xff]   ;;  %v4223_v9 = vld [vmem:[#allocation6 + $0x264] ss:$16 sps:$4 sm:$0xff]  }
  0xe0   :  { %937 = vmatprep.subr.bf16.mxu1 %v4154_v10  ;;  %v4226_v10 = vld [vmem:[#allocation6 + $0x26c] ss:$16 sps:$4 sm:$0xff]  }
  0xe2   :  { %897 = vmatpush2.bf16.msra.mxu0 %v4149_v11  ;;  %v4221_v11 = vld [vmem:[#allocation6 + $0x260] ss:$16 sps:$4 sm:$0xff]  }
  0xe3   :  { %938 = vmatpush2.bf16.msra.mxu1 %v4152_v12  ;;  %898 = vmatprep.subr.bf16.mxu0 %v4157_v13  ;;  %v4224_v12 = vld [vmem:[#allocation6 + $0x268] ss:$16 sps:$4 sm:$0xff]   ;;  %v4229_v13 = vld [vmem:[#allocation6 + $0x244] ss:$16 sps:$4 sm:$0xff]  }
  0xe4   :  { %939 = vmatprep.subr.bf16.mxu1 %v4160_v14  ;;  %v4232_v14 = vld [vmem:[#allocation6 + $0x24c] ss:$16 sps:$4 sm:$0xff]  }
  0xe6   :  { %899 = vmatpush2.bf16.msra.mxu0 %v4155_v15  ;;  %v4227_v15 = vld [vmem:[#allocation6 + $0x240] ss:$16 sps:$4 sm:$0xff]  }
  0xe7   :  { %940 = vmatpush2.bf16.msra.mxu1 %v4158_v16  ;;  %900 = vmatprep.subr.bf16.mxu0 %v4163_v17  ;;  %v4230_v16 = vld [vmem:[#allocation6 + $0x248] ss:$16 sps:$4 sm:$0xff]   ;;  %v4235_v17 = vld [vmem:[#allocation6 + $0x224] ss:$16 sps:$4 sm:$0xff]  }
  0xe8   :  { %941 = vmatprep.subr.bf16.mxu1 %v4166_v18  ;;  %v4238_v18 = vld [vmem:[#allocation6 + $0x22c] ss:$16 sps:$4 sm:$0xff]  }
  0xea   :  { %901 = vmatpush2.bf16.msra.mxu0 %v4161_v19  ;;  %v4233_v19 = vld [vmem:[#allocation6 + $0x220] ss:$16 sps:$4 sm:$0xff]  }
  0xeb   :  { %942 = vmatpush2.bf16.msra.mxu1 %v4164_v20  ;;  %902 = vmatprep.subr.bf16.mxu0 %v4169_v21  ;;  %v4236_v20 = vld [vmem:[#allocation6 + $0x228] ss:$16 sps:$4 sm:$0xff]   ;;  %v4241_v21 = vld [vmem:[#allocation6 + $0x204] ss:$16 sps:$4 sm:$0xff]  }
  0xec   :  { %943 = vmatprep.subr.bf16.mxu1 %v4172_v22  ;;  %v4244_v22 = vld [vmem:[#allocation6 + $0x20c] ss:$16 sps:$4 sm:$0xff]  }
  0xee   :  { %903 = vmatpush2.bf16.msra.mxu0 %v4167_v23  ;;  %v4239_v23 = vld [vmem:[#allocation6 + $0x200] ss:$16 sps:$4 sm:$0xff]  }
  0xef   :  { %944 = vmatpush2.bf16.msra.mxu1 %v4170_v24  ;;  %904 = vmatprep.subr.bf16.mxu0 %v4175_v25  ;;  %v4242_v24 = vld [vmem:[#allocation6 + $0x208] ss:$16 sps:$4 sm:$0xff]   ;;  %v4247_v25 = vld [vmem:[#allocation6 + $0x3e4] ss:$16 sps:$4 sm:$0xff]  }
  0xf0   :  { %945 = vmatprep.subr.bf16.mxu1 %v4178_v26  ;;  %v4250_v26 = vld [vmem:[#allocation6 + $0x3ec] ss:$16 sps:$4 sm:$0xff]  }
  0xf2   :  { %905 = vmatpush2.bf16.msra.mxu0 %v4173_v27  ;;  %v4245_v27 = vld [vmem:[#allocation6 + $0x3e0] ss:$16 sps:$4 sm:$0xff]  }
  0xf3   :  { %946 = vmatpush2.bf16.msra.mxu1 %v4176_v28  ;;  %906 = vmatprep.subr.bf16.mxu0 %v4181_v29  ;;  %v4248_v28 = vld [vmem:[#allocation6 + $0x3e8] ss:$16 sps:$4 sm:$0xff]   ;;  %v4253_v29 = vld [vmem:[#allocation6 + $0x3c4] ss:$16 sps:$4 sm:$0xff]  }
  0xf4   :  { %947 = vmatprep.subr.bf16.mxu1 %v4184_v30  ;;  %v4256_v30 = vld [vmem:[#allocation6 + $0x3cc] ss:$16 sps:$4 sm:$0xff]  }
  0xf6   :  { %907 = vmatpush2.bf16.msra.mxu0 %v4179_v31  ;;  %v4251_v31 = vld [vmem:[#allocation6 + $0x3c0] ss:$16 sps:$4 sm:$0xff]  }
  0xf7   :  { %948 = vmatpush2.bf16.msra.mxu1 %v4182_v32  ;;  %908 = vmatprep.subr.bf16.mxu0 %v4187_v34  ;;  %v4254_v32 = vld [vmem:[#allocation6 + $0x3c8] ss:$16 sps:$4 sm:$0xff]   ;;  %v4262_v34 = vld [vmem:[#allocation6 + $0x3ac] ss:$16 sps:$4 sm:$0xff]  }
  0xf8   :  { %949 = vmatprep.subr.bf16.mxu1 %v4190_v38  ;;  %v4260_v38 = vld [vmem:[#allocation6 + $0x3a8] ss:$16 sps:$4 sm:$0xff]  }
  0xfa   :  { %909 = vmatpush2.bf16.msra.mxu0 %v4185_v33  ;;  %v4259_v33 = vld [vmem:[#allocation6 + $0x3a4] ss:$16 sps:$4 sm:$0xff]  }
  0xfb   :  { %950 = vmatpush2.bf16.msra.mxu1 %v4188_v35  ;;  %910 = vmatprep.subr.bf16.mxu0 %v4193_v39  ;;  %v4257_v35 = vld [vmem:[#allocation6 + $0x3a0] ss:$16 sps:$4 sm:$0xff]   ;;  %v4265_v39 = vld [vmem:[#allocation6 + $0x384] ss:$16 sps:$4 sm:$0xff]  }
  0xfc   :  { %951 = vmatprep.subr.bf16.mxu1 %v4196_v40  ;;  %v4268_v40 = vld [vmem:[#allocation6 + $0x38c] ss:$16 sps:$4 sm:$0xff]  }
  0xfe   :  { %911 = vmatpush2.bf16.msra.mxu0 %v4191_v41  ;;  %v4263_v41 = vld [vmem:[#allocation6 + $0x380] ss:$16 sps:$4 sm:$0xff]  }
  0xff   :  { %952 = vmatpush2.bf16.msra.mxu1 %v4194_v42  ;;  %1405 = vmatprep.subr.bf16.mxu0 %v4199_v45  ;;  %v4266_v42 = vld [vmem:[#allocation6 + $0x388] ss:$16 sps:$4 sm:$0xff]  }
 0x100   :  { %1446 = vmatprep.subr.bf16.mxu1 %v4202_v46  ;;  %v4272_v45 = vld [vmem:[#allocation6 + $0x368] ss:$16 sps:$4 sm:$0xff]   ;;  %v4274_v46 = vld [vmem:[#allocation6 + $0x36c] ss:$16 sps:$4 sm:$0xff]  }
 0x181   :  { %v4022_v47 = vpop.f32.mrf.mxu0 }
 0x182   :  { %v4044_v48 = vpop.f32.mrf.mxu1 }
 0x183   :  { %v4023_v49 = vpop.f32.mrf.mxu0 }
 0x184   :  { %v4024_v50 = vadd.f32 %v4023_v49, %v4022_v47  ;;  %v4045_v51 = vpop.f32.mrf.mxu1  ;;  %v4277_v47 = vld [vmem:[#allocation6 + $0x344] ss:$16 sps:$4 sm:$0xff]   ;;  %v4275_v49 = vld [vmem:[#allocation6 + $0x340] ss:$16 sps:$4 sm:$0xff]  }
 0x185   :  { %v4046_v52 = vadd.f32 %v4045_v51, %v4044_v48  ;;  %v4025_v53 = vpop.f32.mrf.mxu0  ;;  %v4280_v48 = vld [vmem:[#allocation6 + $0x34c] ss:$16 sps:$4 sm:$0xff]   ;;  %v4283_v51 = vld [vmem:[#allocation6 + $0x324] ss:$16 sps:$4 sm:$0xff]  }
 0x186   :  { %v4047_v54 = vpop.f32.mrf.mxu1  ;;  %v991_v53 = vld [vmem:[#allocation8 + $0x8] sm:$0xff] }
 0x187   :  { %v462_v55 = vadd.f32 %v4046_v52, %v4024_v50  ;;  %v4026_v56 = vpop.f32.mrf.mxu0  ;;  %v4278_v50 = vld [vmem:[#allocation6 + $0x348] ss:$16 sps:$4 sm:$0xff]   ;;  %v4286_v52 = vld [vmem:[#allocation6 + $0x32c] ss:$16 sps:$4 sm:$0xff]   ;;  %v996_v54 = vpack.c.bf16 %v991_v53, %v991_v53 }
 0x188   :  { %v4048_v57 = vpop.f32.mrf.mxu1  ;;  %v4284_v56 = vld [vmem:[#allocation6 + $0x328] ss:$16 sps:$4 sm:$0xff]   ;;  %v4316_v53 = vld [vmem:[#allocation6 + $0x48c] ss:$16 sps:$4 sm:$0xff]  }
 0x189   :  { %v472_v60 = vpack.c.bf16 %v462_v55, %v462_v55  ;;  %v4281_v55 = vld [vmem:[#allocation6 + $0x320] ss:$16 sps:$4 sm:$0xff]   ;;  %v4289_v57 = vld [vmem:[#allocation6 + $0x304] ss:$16 sps:$4 sm:$0xff]  }
 0x18b   :  { %913 = vmatmul.mubr.bf16.vlgmr.msra.gmra.mxu0 %v472_v60  ;;  %954 = vmatmul.mubr.bf16.vlgmr.msra.gmra.mxu1 %v472_v60  ;;  %v4290_v60 = vld [vmem:[#allocation6 + $0x308] ss:$16 sps:$4 sm:$0xff]  }
 0x18c   :  { %1406 = vmatpush1.bf16.msra.mxu0 %v4197_v58  ;;  %1447 = vmatpush1.bf16.msra.mxu1 %v4200_v59  ;;  %v4292_v58 = vld [vmem:[#allocation6 + $0x30c] ss:$16 sps:$4 sm:$0xff]   ;;  %v4287_v59 = vld [vmem:[#allocation6 + $0x300] ss:$16 sps:$4 sm:$0xff]  }
 0x18d   :  { %1407 = vmatprep.subr.bf16.mxu0 %v4205_v61  ;;  %1448 = vmatprep.subr.bf16.mxu1 %v4208_v62  ;;  %v4295_v61 = vld [vmem:[#allocation6 + $0x4e4] ss:$16 sps:$4 sm:$0xff]   ;;  %v4298_v62 = vld [vmem:[#allocation6 + $0x4ec] ss:$16 sps:$4 sm:$0xff]  }
 0x18e   :  { %1437 = vmatprep.mubr.bf16.mxu0 %v996_v54  ;;  %1478 = vmatprep.mubr.bf16.mxu1 %v996_v54  ;;  %v4311_v54 = vld [vmem:[#allocation6 + $0x480] ss:$16 sps:$4 sm:$0xff]  }
 0x190   :  { %1408 = vmatpush1.bf16.msra.mxu0 %v4203_v63  ;;  %1449 = vmatpush1.bf16.msra.mxu1 %v4206_v0  ;;  %v4958_v63 = vshrl.u32 %v110_v36, 7 }
 0x191   :  { %1409 = vmatprep.subr.bf16.mxu0 %v4211_v1  ;;  %1450 = vmatprep.subr.bf16.mxu1 %v4214_v2  ;;  %v538_v1 = vld [vmem:[%s5213_s3] sm:$0xf] }
 0x192   :  { %v4961_v0 = vsub.s32 0, %v4958_v63  ;;  %v4967_v2 = vsub.s32 1, %v4958_v63 }
 0x194   :  { %1410 = vmatpush1.bf16.msra.mxu0 %v4209_v3  ;;  %1451 = vmatpush1.bf16.msra.mxu1 %v4212_v4  ;;  %v543_v3 = vrot.slane %v538_v1, %v4961_v0  ;;  %v547_v4 = vrot.slane %v538_v1, %v4967_v2 }
 0x195   :  { %1411 = vmatprep.subr.bf16.mxu0 %v4217_v5  ;;  %1452 = vmatprep.subr.bf16.mxu1 %v4220_v6 }
 0x198   :  { %1412 = vmatpush1.bf16.msra.mxu0 %v4215_v7  ;;  %1453 = vmatpush1.bf16.msra.mxu1 %v4218_v8 }
 0x199   :  { %1413 = vmatprep.subr.bf16.mxu0 %v4223_v9  ;;  %1454 = vmatprep.subr.bf16.mxu1 %v4226_v10 }
 0x19c   :  { %1414 = vmatpush1.bf16.msra.mxu0 %v4221_v11  ;;  %1455 = vmatpush1.bf16.msra.mxu1 %v4224_v12  ;;  %v4972_v11 = vsub.s32 3, %v4958_v63 }
 0x19d   :  { %1415 = vmatprep.subr.bf16.mxu0 %v4229_v13  ;;  %1456 = vmatprep.subr.bf16.mxu1 %v4232_v14 }
 0x1a0   :  { %1416 = vmatpush1.bf16.msra.mxu0 %v4227_v15  ;;  %1457 = vmatpush1.bf16.msra.mxu1 %v4230_v16 }
 0x1a1   :  { %1417 = vmatprep.subr.bf16.mxu0 %v4235_v17  ;;  %1458 = vmatprep.subr.bf16.mxu1 %v4238_v18  ;;  %v555_v17 = vrot.slane %v538_v1, %v4972_v11  ;;  %v4976_v18 = vsub.s32 2, %v4958_v63 }
 0x1a4   :  { %1418 = vmatpush1.bf16.msra.mxu0 %v4233_v19  ;;  %1459 = vmatpush1.bf16.msra.mxu1 %v4236_v20  ;;  %v551_v20 = vrot.slane %v538_v1, %v4976_v18  ;;  %v4326_v1 = vld [vmem:[#allocation6 + $0x448] ss:$16 sps:$4 sm:$0xff]  }
 0x1a5   :  { %1419 = vmatprep.subr.bf16.mxu0 %v4241_v21  ;;  %1460 = vmatprep.subr.bf16.mxu1 %v4244_v22 }
 0x1a8   :  { %1420 = vmatpush1.bf16.msra.mxu0 %v4239_v23  ;;  %1461 = vmatpush1.bf16.msra.mxu1 %v4242_v24 }
 0x1a9   :  { %1421 = vmatprep.subr.bf16.mxu0 %v4247_v25  ;;  %1462 = vmatprep.subr.bf16.mxu1 %v4250_v26 }
 0x1ac   :  { %1422 = vmatpush2.bf16.msra.mxu0 %v4245_v27  ;;  %1463 = vmatpush2.bf16.msra.mxu1 %v4248_v28 }
 0x1ad   :  { %1423 = vmatprep.subr.bf16.mxu0 %v4253_v29  ;;  %1464 = vmatprep.subr.bf16.mxu1 %v4256_v30  ;;  %v981_v29 = vld [vmem:[#allocation9] sm:$0xff] }
 0x1b0   :  { %1424 = vmatpush2.bf16.msra.mxu0 %v4251_v31  ;;  %1465 = vmatpush2.bf16.msra.mxu1 %v4254_v32 }
 0x1b1   :  { %1425 = vmatprep.subr.bf16.mxu0 %v4259_v33  ;;  %1466 = vmatprep.subr.bf16.mxu1 %v4262_v34 }
 0x1b4   :  { %1426 = vmatpush2.bf16.msra.mxu0 %v4257_v35  ;;  %1467 = vmatpush2.bf16.msra.mxu1 %v4260_v38 }
 0x1b5   :  { %1427 = vmatprep.subr.bf16.mxu0 %v4265_v39  ;;  %1468 = vmatprep.subr.bf16.mxu1 %v4268_v40 }
 0x1b8   :  { %1428 = vmatpush2.bf16.msra.mxu0 %v4263_v41  ;;  %1469 = vmatpush2.bf16.msra.mxu1 %v4266_v42  ;;  %v4293_v41 = vld [vmem:[#allocation6 + $0x4e0] ss:$16 sps:$4 sm:$0xff]   ;;  %v4296_v42 = vld [vmem:[#allocation6 + $0x4e8] ss:$16 sps:$4 sm:$0xff]  }
 0x1b9   :  { %1429 = vmatprep.subr.bf16.mxu0 %v4271_v44  ;;  %1470 = vmatprep.subr.bf16.mxu1 %v4274_v46  ;;  %v4301_v44 = vld [vmem:[#allocation6 + $0x4c4] ss:$16 sps:$4 sm:$0xff]   ;;  %v4299_v46 = vld [vmem:[#allocation6 + $0x4c0] ss:$16 sps:$4 sm:$0xff]  }
 0x1bc   :  { %1430 = vmatpush2.bf16.msra.mxu0 %v4269_v43  ;;  %1471 = vmatpush2.bf16.msra.mxu1 %v4272_v45  ;;  %v4304_v45 = vld [vmem:[#allocation6 + $0x4cc] ss:$16 sps:$4 sm:$0xff]  }
 0x1bd   :  { %1431 = vmatprep.subr.bf16.mxu0 %v4277_v47  ;;  %1472 = vmatprep.subr.bf16.mxu1 %v4280_v48  ;;  %v4302_v47 = vld [vmem:[#allocation6 + $0x4c8] ss:$16 sps:$4 sm:$0xff]   ;;  %v4307_v48 = vld [vmem:[#allocation6 + $0x4a4] ss:$16 sps:$4 sm:$0xff]  }
 0x1c0   :  { %1432 = vmatpush2.bf16.msra.mxu0 %v4275_v49  ;;  %1473 = vmatpush2.bf16.msra.mxu1 %v4278_v50  ;;  %v4310_v49 = vld [vmem:[#allocation6 + $0x4ac] ss:$16 sps:$4 sm:$0xff]   ;;  %v4305_v50 = vld [vmem:[#allocation6 + $0x4a0] ss:$16 sps:$4 sm:$0xff]  }
 0x1c1   :  { %1433 = vmatprep.subr.bf16.mxu0 %v4283_v51  ;;  %1474 = vmatprep.subr.bf16.mxu1 %v4286_v52  ;;  %v4308_v51 = vld [vmem:[#allocation6 + $0x4a8] ss:$16 sps:$4 sm:$0xff]   ;;  %v4313_v52 = vld [vmem:[#allocation6 + $0x484] ss:$16 sps:$4 sm:$0xff]  }
 0x1c4   :  { %1434 = vmatpush2.bf16.msra.mxu0 %v4281_v55  ;;  %1475 = vmatpush2.bf16.msra.mxu1 %v4284_v56  ;;  %v4314_v55 = vld [vmem:[#allocation6 + $0x488] ss:$16 sps:$4 sm:$0xff]   ;;  %v4319_v56 = vld [vmem:[#allocation6 + $0x464] ss:$16 sps:$4 sm:$0xff]  }
 0x1c5   :  { %1435 = vmatprep.subr.bf16.mxu0 %v4289_v57  ;;  %1476 = vmatprep.subr.bf16.mxu1 %v4292_v58  ;;  %v4322_v57 = vld [vmem:[#allocation6 + $0x46c] ss:$16 sps:$4 sm:$0xff]   ;;  %v4317_v58 = vld [vmem:[#allocation6 + $0x460] ss:$16 sps:$4 sm:$0xff]  }
 0x1c8   :  { %1436 = vmatpush2.bf16.msra.mxu0 %v4287_v59  ;;  %1477 = vmatpush2.bf16.msra.mxu1 %v4290_v60  ;;  %v4320_v59 = vld [vmem:[#allocation6 + $0x468] ss:$16 sps:$4 sm:$0xff]   ;;  %v4325_v60 = vld [vmem:[#allocation6 + $0x444] ss:$16 sps:$4 sm:$0xff]  }
 0x1c9   :  { %1933 = vmatprep.subr.bf16.mxu0 %v4295_v61  ;;  %1974 = vmatprep.subr.bf16.mxu1 %v4298_v62  ;;  %v4328_v61 = vld [vmem:[#allocation6 + $0x44c] ss:$16 sps:$4 sm:$0xff]   ;;  %v4323_v62 = vld [vmem:[#allocation6 + $0x440] ss:$16 sps:$4 sm:$0xff]  }
 0x24b   :  { %v914_v5 = vpop.f32.mrf.mxu0  ;;  %v955_v6 = vpop.f32.mrf.mxu1 }
 0x24c   :  { %v915_v7 = vadd.f32 %v914_v5, %v543_v3  ;;  %v956_v23 = vadd.f32 %v955_v6, %v551_v20  ;;  %v4331_v3 = vld [vmem:[#allocation6 + $0x424] ss:$16 sps:$4 sm:$0xff]   ;;  %v4329_v5 = vld [vmem:[#allocation6 + $0x420] ss:$16 sps:$4 sm:$0xff]   ;;  %v4332_v6 = vld [vmem:[#allocation6 + $0x428] ss:$16 sps:$4 sm:$0xff]  }
 0x24d   :  { %v916_v8 = vpop.f32.mrf.mxu0  ;;  %v957_v36 = vpop.f32.mrf.mxu1  ;;  %v4355_v20 = vld [vmem:[#allocation6 + $0x5a4] ss:$16 sps:$4 sm:$0xff]  }
 0x24e   :  { %v3735_v9 = vmul.f32 -1.442695, %v915_v7  ;;  %v917_v10 = vadd.f32 %v916_v8, %v547_v4  ;;  %v958_v19 = vadd.f32 %v957_v36, %v555_v17  ;;  %v4334_v4 = vld [vmem:[#allocation6 + $0x42c] ss:$16 sps:$4 sm:$0xff]   ;;  %v4337_v7 = vld [vmem:[#allocation6 + $0x404] ss:$16 sps:$4 sm:$0xff]  }
 0x24f   :  { %v918_v12 = vpop.f32.mrf.mxu0  ;;  %v959_v13 = vpop.f32.mrf.mxu1  ;;  %v4340_v8 = vld [vmem:[#allocation6 + $0x40c] ss:$16 sps:$4 sm:$0xff]   ;;  %v4335_v36 = vld [vmem:[#allocation6 + $0x400] ss:$16 sps:$4 sm:$0xff]  }
 0x250   :  { %4581 = vpow2.f32 %v3735_v9  ;;  %v3736_v14 = vmul.f32 -1.442695, %v917_v10  ;;  %v3737_v21 = vmul.f32 -1.442695, %v958_v19  ;;  %v4338_v9 = vld [vmem:[#allocation6 + $0x408] ss:$16 sps:$4 sm:$0xff]  }
 0x251   :  { %v919_v15 = vpop.f32.mrf.mxu0  ;;  %v960_v16 = vpop.f32.mrf.mxu1  ;;  %v4343_v10 = vld [vmem:[#allocation6 + $0x5e4] ss:$16 sps:$4 sm:$0xff]   ;;  %v4346_v12 = vld [vmem:[#allocation6 + $0x5ec] ss:$16 sps:$4 sm:$0xff]   ;;  %v4341_v13 = vld [vmem:[#allocation6 + $0x5e0] ss:$16 sps:$4 sm:$0xff]  }
 0x252   :  { %4583 = vpow2.f32 %v3736_v14  ;;  %v4344_v14 = vld [vmem:[#allocation6 + $0x5e8] ss:$16 sps:$4 sm:$0xff]   ;;  %v4349_v15 = vld [vmem:[#allocation6 + $0x5c4] ss:$16 sps:$4 sm:$0xff]   ;;  %v4352_v16 = vld [vmem:[#allocation6 + $0x5cc] ss:$16 sps:$4 sm:$0xff]  }
 0x253   :  { %4585 = vpow2.f32 %v3737_v21  ;;  %v4347_v17 = vld [vmem:[#allocation6 + $0x5c0] ss:$16 sps:$4 sm:$0xff]   ;;  %v4350_v19 = vld [vmem:[#allocation6 + $0x5c8] ss:$16 sps:$4 sm:$0xff]   ;;  %v4358_v21 = vld [vmem:[#allocation6 + $0x5ac] ss:$16 sps:$4 sm:$0xff]  }
 0x25d   :  { %v4582_v22 = vpop.eup %4581 }
 0x25e   :  { %v965_v24 = vadd.f32 1.0, %v4582_v22  ;;  %v4353_v22 = vld [vmem:[#allocation6 + $0x5a0] ss:$16 sps:$4 sm:$0xff]  }
 0x25f   :  { %v4584_v25 = vpop.eup %4583 }
 0x260   :  { %4587 = vrcp.f32 %v965_v24  ;;  %v971_v26 = vadd.f32 1.0, %v4584_v25  ;;  %v4586_v27 = vpop.eup %4585  ;;  %v4361_v24 = vld [vmem:[#allocation6 + $0x584] ss:$16 sps:$4 sm:$0xff]   ;;  %v4364_v25 = vld [vmem:[#allocation6 + $0x58c] ss:$16 sps:$4 sm:$0xff]  }
 0x261   :  { %4589 = vtanh.f32 %v956_v23  ;;  %v978_v32 = vadd.f32 1.0, %v4586_v27  ;;  %v4356_v23 = vld [vmem:[#allocation6 + $0x5a8] ss:$16 sps:$4 sm:$0xff]  }
 0x262   :  { %4591 = vrcp.f32 %v971_v26  ;;  %v4359_v26 = vld [vmem:[#allocation6 + $0x580] ss:$16 sps:$4 sm:$0xff]   ;;  %v4362_v27 = vld [vmem:[#allocation6 + $0x588] ss:$16 sps:$4 sm:$0xff]  }
 0x263   :  { %4593 = vrcp.f32 %v978_v32  ;;  %v4373_v32 = vld [vmem:[#allocation6 + $0x544] ss:$16 sps:$4 sm:$0xff]  }
 0x26d   :  { %v4588_v28 = vpop.eup %4587 }
 0x26e   :  { %v4590_v30 = vpop.eup %4589 }
 0x26f   :  { %v4592_v31 = vpop.eup %4591  ;;  %v983_v33 = vmul.f32 %v4590_v30, %v4588_v28  ;;  %v4365_v28 = vld [vmem:[#allocation6 + $0x560] ss:$16 sps:$4 sm:$0xff]   ;;  %v4368_v30 = vld [vmem:[#allocation6 + $0x568] ss:$16 sps:$4 sm:$0xff]  }
 0x270   :  { %v982_v34 = vmul.f32 %v4592_v31, %v981_v29  ;;  %v4594_v38 = vpop.eup %4593  ;;  %v4367_v29 = vld [vmem:[#allocation6 + $0x564] ss:$16 sps:$4 sm:$0xff]   ;;  %v4370_v31 = vld [vmem:[#allocation6 + $0x56c] ss:$16 sps:$4 sm:$0xff]  }
 0x272   :  { %v984_v35 = vadd.f32 %v983_v33, %v982_v34  ;;  %v4376_v33 = vld [vmem:[#allocation6 + $0x54c] ss:$16 sps:$4 sm:$0xff]   ;;  %v4371_v34 = vld [vmem:[#allocation6 + $0x540] ss:$16 sps:$4 sm:$0xff]  }
 0x274   :  { %988 = vst [vmem:[#allocation15] sm:$0xff] %v984_v35  ;;  %4595 = vtanh.f32 %v984_v35  ;;  %v4374_v35 = vld [vmem:[#allocation6 + $0x548] ss:$16 sps:$4 sm:$0xff]  }
 0x281   :  { %v4596_v39 = vpop.eup %4595 }
 0x282   :  { %v986_v40 = vmul.f32 %v4596_v39, %v4594_v38  ;;  %v4379_v38 = vld [vmem:[#allocation6 + $0x524] ss:$16 sps:$4 sm:$0xff]   ;;  %v4382_v39 = vld [vmem:[#allocation6 + $0x52c] ss:$16 sps:$4 sm:$0xff]  }
 0x284   :  { %v995_v43 = vpack.c.bf16 %v986_v40, %v986_v40  ;;  %987 = vst [vmem:[#allocation13] sm:$0xff] %v986_v40  ;;  %v1519_v40 = vld [vmem:[#allocation8 + $0x10] sm:$0xff] }
 0x286   :  { %1438 = vmatmul.mubr.bf16.vlgmr.msra.gmra.mxu0 %v995_v43  ;;  %1479 = vmatmul.mubr.bf16.vlgmr.msra.gmra.mxu1 %v995_v43  ;;  %v4380_v43 = vld [vmem:[#allocation6 + $0x528] ss:$16 sps:$4 sm:$0xff]  }
 0x287   :  { %1934 = vmatpush1.bf16.msra.mxu0 %v4293_v41  ;;  %1975 = vmatpush1.bf16.msra.mxu1 %v4296_v42  ;;  %v1524_v41 = vpack.c.bf16 %v1519_v40, %v1519_v40  ;;  %v4377_v42 = vld [vmem:[#allocation6 + $0x520] ss:$16 sps:$4 sm:$0xff]   ;;  %v4412_v40 = vld [vmem:[#allocation6 + $0x68c] ss:$16 sps:$4 sm:$0xff]  }
 0x288   :  { %1935 = vmatprep.subr.bf16.mxu0 %v4301_v44  ;;  %1976 = vmatprep.subr.bf16.mxu1 %v4304_v45  ;;  %v4385_v44 = vld [vmem:[#allocation6 + $0x504] ss:$16 sps:$4 sm:$0xff]   ;;  %v4388_v45 = vld [vmem:[#allocation6 + $0x50c] ss:$16 sps:$4 sm:$0xff]  }
 0x289   :  { %1965 = vmatprep.mubr.bf16.mxu0 %v1524_v41  ;;  %2006 = vmatprep.mubr.bf16.mxu1 %v1524_v41  ;;  %v4407_v41 = vld [vmem:[#allocation6 + $0x680] ss:$16 sps:$4 sm:$0xff]  }
 0x28b   :  { %1936 = vmatpush1.bf16.msra.mxu0 %v4299_v46  ;;  %1977 = vmatpush1.bf16.msra.mxu1 %v4302_v47  ;;  %v4383_v46 = vld [vmem:[#allocation6 + $0x500] ss:$16 sps:$4 sm:$0xff]   ;;  %v4386_v47 = vld [vmem:[#allocation6 + $0x508] ss:$16 sps:$4 sm:$0xff]  }
 0x28c   :  { %1937 = vmatprep.subr.bf16.mxu0 %v4307_v48  ;;  %1978 = vmatprep.subr.bf16.mxu1 %v4310_v49  ;;  %v4391_v48 = vld [vmem:[#allocation6 + $0x6e4] ss:$16 sps:$4 sm:$0xff]   ;;  %v4394_v49 = vld [vmem:[#allocation6 + $0x6ec] ss:$16 sps:$4 sm:$0xff]  }
 0x28f   :  { %1938 = vmatpush1.bf16.msra.mxu0 %v4305_v50  ;;  %1979 = vmatpush1.bf16.msra.mxu1 %v4308_v51  ;;  %v3738_v50 = vld [vmem:[%s5213_s3 + $0x4] sm:$0xf] }
 0x290   :  { %1939 = vmatprep.subr.bf16.mxu0 %v4313_v52  ;;  %1980 = vmatprep.subr.bf16.mxu1 %v4316_v53  ;;  %v1068_v51 = vrot.slane %v3738_v50, %v4961_v0  ;;  %v1072_v52 = vrot.slane %v3738_v50, %v4967_v2 }
 0x293   :  { %1940 = vmatpush1.bf16.msra.mxu0 %v4311_v54  ;;  %1981 = vmatpush1.bf16.msra.mxu1 %v4314_v55 }
 0x294   :  { %1941 = vmatprep.subr.bf16.mxu0 %v4319_v56  ;;  %1982 = vmatprep.subr.bf16.mxu1 %v4322_v57 }
 0x297   :  { %1942 = vmatpush1.bf16.msra.mxu0 %v4317_v58  ;;  %1983 = vmatpush1.bf16.msra.mxu1 %v4320_v59 }
 0x298   :  { %1943 = vmatprep.subr.bf16.mxu0 %v4325_v60  ;;  %1984 = vmatprep.subr.bf16.mxu1 %v4328_v61 }
 0x29b   :  { %1944 = vmatpush1.bf16.msra.mxu0 %v4323_v62  ;;  %1985 = vmatpush1.bf16.msra.mxu1 %v4326_v1 }
 0x29c   :  { %1945 = vmatprep.subr.bf16.mxu0 %v4331_v3  ;;  %1986 = vmatprep.subr.bf16.mxu1 %v4334_v4  ;;  %v1080_v4 = vrot.slane %v3738_v50, %v4972_v11 }
 0x29f   :  { %1946 = vmatpush1.bf16.msra.mxu0 %v4329_v5  ;;  %1987 = vmatpush1.bf16.msra.mxu1 %v4332_v6  ;;  %v1076_v6 = vrot.slane %v3738_v50, %v4976_v18  ;;  %v4422_v50 = vld [vmem:[#allocation6 + $0x648] ss:$16 sps:$4 sm:$0xff]  }
 0x2a0   :  { %1947 = vmatprep.subr.bf16.mxu0 %v4337_v7  ;;  %1988 = vmatprep.subr.bf16.mxu1 %v4340_v8 }
 0x2a3   :  { %1948 = vmatpush1.bf16.msra.mxu0 %v4335_v36  ;;  %1989 = vmatpush1.bf16.msra.mxu1 %v4338_v9 }
 0x2a4   :  { %1949 = vmatprep.subr.bf16.mxu0 %v4343_v10  ;;  %1990 = vmatprep.subr.bf16.mxu1 %v4346_v12 }
 0x2a7   :  { %1950 = vmatpush2.bf16.msra.mxu0 %v4341_v13  ;;  %1991 = vmatpush2.bf16.msra.mxu1 %v4344_v14 }
 0x2a8   :  { %1951 = vmatprep.subr.bf16.mxu0 %v4349_v15  ;;  %1992 = vmatprep.subr.bf16.mxu1 %v4352_v16  ;;  %v1507_v15 = vld [vmem:[#allocation9 + $0x8] sm:$0xff] }
 0x2ab   :  { %1952 = vmatpush2.bf16.msra.mxu0 %v4347_v17  ;;  %1993 = vmatpush2.bf16.msra.mxu1 %v4350_v19 }
 0x2ac   :  { %1953 = vmatprep.subr.bf16.mxu0 %v4355_v20  ;;  %1994 = vmatprep.subr.bf16.mxu1 %v4358_v21 }
 0x2af   :  { %1954 = vmatpush2.bf16.msra.mxu0 %v4353_v22  ;;  %1995 = vmatpush2.bf16.msra.mxu1 %v4356_v23 }
 0x2b0   :  { %1955 = vmatprep.subr.bf16.mxu0 %v4361_v24  ;;  %1996 = vmatprep.subr.bf16.mxu1 %v4364_v25 }
 0x2b3   :  { %1956 = vmatpush2.bf16.msra.mxu0 %v4359_v26  ;;  %1997 = vmatpush2.bf16.msra.mxu1 %v4362_v27  ;;  %v4389_v26 = vld [vmem:[#allocation6 + $0x6e0] ss:$16 sps:$4 sm:$0xff]   ;;  %v4392_v27 = vld [vmem:[#allocation6 + $0x6e8] ss:$16 sps:$4 sm:$0xff]  }
 0x2b4   :  { %1957 = vmatprep.subr.bf16.mxu0 %v4367_v29  ;;  %1998 = vmatprep.subr.bf16.mxu1 %v4370_v31  ;;  %v4397_v29 = vld [vmem:[#allocation6 + $0x6c4] ss:$16 sps:$4 sm:$0xff]   ;;  %v4395_v31 = vld [vmem:[#allocation6 + $0x6c0] ss:$16 sps:$4 sm:$0xff]  }
 0x2b7   :  { %1958 = vmatpush2.bf16.msra.mxu0 %v4365_v28  ;;  %1999 = vmatpush2.bf16.msra.mxu1 %v4368_v30  ;;  %v4400_v30 = vld [vmem:[#allocation6 + $0x6cc] ss:$16 sps:$4 sm:$0xff]  }
 0x2b8   :  { %1959 = vmatprep.subr.bf16.mxu0 %v4373_v32  ;;  %2000 = vmatprep.subr.bf16.mxu1 %v4376_v33  ;;  %v4398_v32 = vld [vmem:[#allocation6 + $0x6c8] ss:$16 sps:$4 sm:$0xff]   ;;  %v4403_v33 = vld [vmem:[#allocation6 + $0x6a4] ss:$16 sps:$4 sm:$0xff]  }
 0x2bb   :  { %1960 = vmatpush2.bf16.msra.mxu0 %v4371_v34  ;;  %2001 = vmatpush2.bf16.msra.mxu1 %v4374_v35  ;;  %v4406_v34 = vld [vmem:[#allocation6 + $0x6ac] ss:$16 sps:$4 sm:$0xff]   ;;  %v4401_v35 = vld [vmem:[#allocation6 + $0x6a0] ss:$16 sps:$4 sm:$0xff]  }
 0x2bc   :  { %1961 = vmatprep.subr.bf16.mxu0 %v4379_v38  ;;  %2002 = vmatprep.subr.bf16.mxu1 %v4382_v39  ;;  %v4404_v38 = vld [vmem:[#allocation6 + $0x6a8] ss:$16 sps:$4 sm:$0xff]   ;;  %v4409_v39 = vld [vmem:[#allocation6 + $0x684] ss:$16 sps:$4 sm:$0xff]  }
 0x2bf   :  { %1962 = vmatpush2.bf16.msra.mxu0 %v4377_v42  ;;  %2003 = vmatpush2.bf16.msra.mxu1 %v4380_v43  ;;  %v4410_v42 = vld [vmem:[#allocation6 + $0x688] ss:$16 sps:$4 sm:$0xff]   ;;  %v4415_v43 = vld [vmem:[#allocation6 + $0x664] ss:$16 sps:$4 sm:$0xff]  }
 0x2c0   :  { %1963 = vmatprep.subr.bf16.mxu0 %v4385_v44  ;;  %2004 = vmatprep.subr.bf16.mxu1 %v4388_v45  ;;  %v4418_v44 = vld [vmem:[#allocation6 + $0x66c] ss:$16 sps:$4 sm:$0xff]   ;;  %v4413_v45 = vld [vmem:[#allocation6 + $0x660] ss:$16 sps:$4 sm:$0xff]  }
 0x2c3   :  { %1964 = vmatpush2.bf16.msra.mxu0 %v4383_v46  ;;  %2005 = vmatpush2.bf16.msra.mxu1 %v4386_v47  ;;  %v4416_v46 = vld [vmem:[#allocation6 + $0x668] ss:$16 sps:$4 sm:$0xff]   ;;  %v4421_v47 = vld [vmem:[#allocation6 + $0x644] ss:$16 sps:$4 sm:$0xff]  }
 0x2c4   :  { %2461 = vmatprep.subr.bf16.mxu0 %v4391_v48  ;;  %2502 = vmatprep.subr.bf16.mxu1 %v4394_v49  ;;  %v4424_v48 = vld [vmem:[#allocation6 + $0x64c] ss:$16 sps:$4 sm:$0xff]   ;;  %v4419_v49 = vld [vmem:[#allocation6 + $0x640] ss:$16 sps:$4 sm:$0xff]  }
 0x346   :  { %v1439_v53 = vpop.f32.mrf.mxu0  ;;  %v1480_v54 = vpop.f32.mrf.mxu1 }
 0x347   :  { %v1440_v55 = vadd.f32 %v1439_v53, %v1068_v51  ;;  %v1481_v36 = vadd.f32 %v1480_v54, %v1076_v6  ;;  %v4427_v51 = vld [vmem:[#allocation6 + $0x624] ss:$16 sps:$4 sm:$0xff]   ;;  %v4425_v53 = vld [vmem:[#allocation6 + $0x620] ss:$16 sps:$4 sm:$0xff]   ;;  %v4428_v54 = vld [vmem:[#allocation6 + $0x628] ss:$16 sps:$4 sm:$0xff]  }
 0x348   :  { %v1441_v56 = vpop.f32.mrf.mxu0  ;;  %v1482_v57 = vpop.f32.mrf.mxu1  ;;  %v4451_v6 = vld [vmem:[#allocation6 + $0x7a4] ss:$16 sps:$4 sm:$0xff]  }
 0x349   :  { %v3803_v58 = vmul.f32 -1.442695, %v1440_v55  ;;  %v1442_v59 = vadd.f32 %v1441_v56, %v1072_v52  ;;  %v1483_v5 = vadd.f32 %v1482_v57, %v1080_v4  ;;  %v4430_v52 = vld [vmem:[#allocation6 + $0x62c] ss:$16 sps:$4 sm:$0xff]   ;;  %v4433_v55 = vld [vmem:[#allocation6 + $0x604] ss:$16 sps:$4 sm:$0xff]  }
 0x34a   :  { %v1443_v60 = vpop.f32.mrf.mxu0  ;;  %v1484_v61 = vpop.f32.mrf.mxu1  ;;  %v4436_v56 = vld [vmem:[#allocation6 + $0x60c] ss:$16 sps:$4 sm:$0xff]   ;;  %v4431_v57 = vld [vmem:[#allocation6 + $0x600] ss:$16 sps:$4 sm:$0xff]  }
 0x34b   :  { %4597 = vpow2.f32 %v3803_v58  ;;  %v3804_v62 = vmul.f32 -1.442695, %v1442_v59  ;;  %v3805_v7 = vmul.f32 -1.442695, %v1483_v5  ;;  %v4434_v58 = vld [vmem:[#allocation6 + $0x608] ss:$16 sps:$4 sm:$0xff]  }
 0x34c   :  { %v1444_v1 = vpop.f32.mrf.mxu0  ;;  %v1485_v3 = vpop.f32.mrf.mxu1  ;;  %v4439_v59 = vld [vmem:[#allocation6 + $0x7e4] ss:$16 sps:$4 sm:$0xff]   ;;  %v4442_v60 = vld [vmem:[#allocation6 + $0x7ec] ss:$16 sps:$4 sm:$0xff]   ;;  %v4437_v61 = vld [vmem:[#allocation6 + $0x7e0] ss:$16 sps:$4 sm:$0xff]  }
 0x34d   :  { %4599 = vpow2.f32 %v3804_v62  ;;  %v4440_v62 = vld [vmem:[#allocation6 + $0x7e8] ss:$16 sps:$4 sm:$0xff]   ;;  %v4445_v1 = vld [vmem:[#allocation6 + $0x7c4] ss:$16 sps:$4 sm:$0xff]   ;;  %v4448_v3 = vld [vmem:[#allocation6 + $0x7cc] ss:$16 sps:$4 sm:$0xff]  }
 0x34e   :  { %4601 = vpow2.f32 %v3805_v7  ;;  %v4443_v4 = vld [vmem:[#allocation6 + $0x7c0] ss:$16 sps:$4 sm:$0xff]   ;;  %v4446_v5 = vld [vmem:[#allocation6 + $0x7c8] ss:$16 sps:$4 sm:$0xff]   ;;  %v4454_v7 = vld [vmem:[#allocation6 + $0x7ac] ss:$16 sps:$4 sm:$0xff]  }
 0x358   :  { %v4598_v8 = vpop.eup %4597 }
 0x359   :  { %v1490_v9 = vadd.f32 1.0, %v4598_v8  ;;  %v4449_v8 = vld [vmem:[#allocation6 + $0x7a0] ss:$16 sps:$4 sm:$0xff]  }
 0x35a   :  { %v4600_v10 = vpop.eup %4599 }
 0x35b   :  { %4603 = vrcp.f32 %v1490_v9  ;;  %v1496_v12 = vadd.f32 1.0, %v4600_v10  ;;  %v4602_v13 = vpop.eup %4601  ;;  %v4457_v9 = vld [vmem:[#allocation6 + $0x784] ss:$16 sps:$4 sm:$0xff]   ;;  %v4460_v10 = vld [vmem:[#allocation6 + $0x78c] ss:$16 sps:$4 sm:$0xff]  }
 0x35c   :  { %4605 = vtanh.f32 %v1481_v36  ;;  %v1503_v19 = vadd.f32 1.0, %v4602_v13  ;;  %v4452_v36 = vld [vmem:[#allocation6 + $0x7a8] ss:$16 sps:$4 sm:$0xff]  }
 0x35d   :  { %4607 = vrcp.f32 %v1496_v12  ;;  %v4455_v12 = vld [vmem:[#allocation6 + $0x780] ss:$16 sps:$4 sm:$0xff]   ;;  %v4458_v13 = vld [vmem:[#allocation6 + $0x788] ss:$16 sps:$4 sm:$0xff]  }
 0x35e   :  { %4609 = vrcp.f32 %v1503_v19  ;;  %v4469_v19 = vld [vmem:[#allocation6 + $0x744] ss:$16 sps:$4 sm:$0xff]  }
 0x368   :  { %v4604_v14 = vpop.eup %4603 }
 0x369   :  { %v4606_v16 = vpop.eup %4605 }
 0x36a   :  { %v4608_v17 = vpop.eup %4607  ;;  %v1509_v20 = vmul.f32 %v4606_v16, %v4604_v14  ;;  %v4461_v14 = vld [vmem:[#allocation6 + $0x760] ss:$16 sps:$4 sm:$0xff]   ;;  %v4464_v16 = vld [vmem:[#allocation6 + $0x768] ss:$16 sps:$4 sm:$0xff]  }
 0x36b   :  { %v1508_v21 = vmul.f32 %v4608_v17, %v1507_v15  ;;  %v4610_v23 = vpop.eup %4609  ;;  %v4463_v15 = vld [vmem:[#allocation6 + $0x764] ss:$16 sps:$4 sm:$0xff]   ;;  %v4466_v17 = vld [vmem:[#allocation6 + $0x76c] ss:$16 sps:$4 sm:$0xff]  }
 0x36d   :  { %v1510_v22 = vadd.f32 %v1509_v20, %v1508_v21  ;;  %v4472_v20 = vld [vmem:[#allocation6 + $0x74c] ss:$16 sps:$4 sm:$0xff]   ;;  %v4467_v21 = vld [vmem:[#allocation6 + $0x740] ss:$16 sps:$4 sm:$0xff]  }
 0x36f   :  { %1516 = vst [vmem:[#allocation15 + $0x8] sm:$0xff] %v1510_v22  ;;  %4611 = vtanh.f32 %v1510_v22  ;;  %v4470_v22 = vld [vmem:[#allocation6 + $0x748] ss:$16 sps:$4 sm:$0xff]  }
 0x37c   :  { %v4612_v24 = vpop.eup %4611 }
 0x37d   :  { %v1512_v25 = vmul.f32 %v4612_v24, %v4610_v23  ;;  %v4475_v23 = vld [vmem:[#allocation6 + $0x724] ss:$16 sps:$4 sm:$0xff]   ;;  %v4478_v24 = vld [vmem:[#allocation6 + $0x72c] ss:$16 sps:$4 sm:$0xff]  }
 0x37f   :  { %v1523_v28 = vpack.c.bf16 %v1512_v25, %v1512_v25  ;;  %1514 = vst [vmem:[#allocation13 + $0x8] sm:$0xff] %v1512_v25  ;;  %v2047_v25 = vld [vmem:[#allocation8 + $0x18] sm:$0xff] }
 0x381   :  { %1966 = vmatmul.mubr.bf16.vlgmr.msra.gmra.mxu0 %v1523_v28  ;;  %2007 = vmatmul.mubr.bf16.vlgmr.msra.gmra.mxu1 %v1523_v28  ;;  %v4476_v28 = vld [vmem:[#allocation6 + $0x728] ss:$16 sps:$4 sm:$0xff]  }
 0x382   :  { %2462 = vmatpush1.bf16.msra.mxu0 %v4389_v26  ;;  %2503 = vmatpush1.bf16.msra.mxu1 %v4392_v27  ;;  %v2052_v26 = vpack.c.bf16 %v2047_v25, %v2047_v25  ;;  %v4473_v27 = vld [vmem:[#allocation6 + $0x720] ss:$16 sps:$4 sm:$0xff]  }
 0x383   :  { %2463 = vmatprep.subr.bf16.mxu0 %v4397_v29  ;;  %2504 = vmatprep.subr.bf16.mxu1 %v4400_v30  ;;  %v4481_v29 = vld [vmem:[#allocation6 + $0x704] ss:$16 sps:$4 sm:$0xff]   ;;  %v4484_v30 = vld [vmem:[#allocation6 + $0x70c] ss:$16 sps:$4 sm:$0xff]  }
 0x384   :  { %2493 = vmatprep.mubr.bf16.mxu0 %v2052_v26  ;;  %2534 = vmatprep.mubr.bf16.mxu1 %v2052_v26 }
 0x386   :  { %2464 = vmatpush1.bf16.msra.mxu0 %v4395_v31  ;;  %2505 = vmatpush1.bf16.msra.mxu1 %v4398_v32  ;;  %v4479_v31 = vld [vmem:[#allocation6 + $0x700] ss:$16 sps:$4 sm:$0xff]   ;;  %v4482_v32 = vld [vmem:[#allocation6 + $0x708] ss:$16 sps:$4 sm:$0xff]  }
 0x387   :  { %2465 = vmatprep.subr.bf16.mxu0 %v4403_v33  ;;  %2506 = vmatprep.subr.bf16.mxu1 %v4406_v34  ;;  %v3806_v33 = vld [vmem:[%s5213_s3 + $0x8] sm:$0xf] }
 0x388   :  { %v1596_v34 = vrot.slane %v3806_v33, %v4961_v0 }
 0x38a   :  { %2466 = vmatpush1.bf16.msra.mxu0 %v4401_v35  ;;  %2507 = vmatpush1.bf16.msra.mxu1 %v4404_v38  ;;  %v1600_v35 = vrot.slane %v3806_v33, %v4967_v2 }
 0x38b   :  { %2467 = vmatprep.subr.bf16.mxu0 %v4409_v39  ;;  %2508 = vmatprep.subr.bf16.mxu1 %v4412_v40 }
 0x38e   :  { %2468 = vmatpush1.bf16.msra.mxu0 %v4407_v41  ;;  %2509 = vmatpush1.bf16.msra.mxu1 %v4410_v42 }
 0x38f   :  { %2469 = vmatprep.subr.bf16.mxu0 %v4415_v43  ;;  %2510 = vmatprep.subr.bf16.mxu1 %v4418_v44 }
 0x392   :  { %2470 = vmatpush1.bf16.msra.mxu0 %v4413_v45  ;;  %2511 = vmatpush1.bf16.msra.mxu1 %v4416_v46 }
 0x393   :  { %2471 = vmatprep.subr.bf16.mxu0 %v4421_v47  ;;  %2512 = vmatprep.subr.bf16.mxu1 %v4424_v48 }
 0x396   :  { %2472 = vmatpush1.bf16.msra.mxu0 %v4419_v49  ;;  %2513 = vmatpush1.bf16.msra.mxu1 %v4422_v50  ;;  %v1608_v50 = vrot.slane %v3806_v33, %v4972_v11 }
 0x397   :  { %2473 = vmatprep.subr.bf16.mxu0 %v4427_v51  ;;  %2514 = vmatprep.subr.bf16.mxu1 %v4430_v52  ;;  %v1604_v52 = vrot.slane %v3806_v33, %v4976_v18 }
 0x39a   :  { %2474 = vmatpush1.bf16.msra.mxu0 %v4425_v53  ;;  %2515 = vmatpush1.bf16.msra.mxu1 %v4428_v54 }
 0x39b   :  { %2475 = vmatprep.subr.bf16.mxu0 %v4433_v55  ;;  %2516 = vmatprep.subr.bf16.mxu1 %v4436_v56 }
 0x39e   :  { %2476 = vmatpush1.bf16.msra.mxu0 %v4431_v57  ;;  %2517 = vmatpush1.bf16.msra.mxu1 %v4434_v58 }
 0x39f   :  { %2477 = vmatprep.subr.bf16.mxu0 %v4439_v59  ;;  %2518 = vmatprep.subr.bf16.mxu1 %v4442_v60 }
 0x3a2   :  { %2478 = vmatpush2.bf16.msra.mxu0 %v4437_v61  ;;  %2519 = vmatpush2.bf16.msra.mxu1 %v4440_v62  ;;  %v2035_v61 = vld [vmem:[#allocation9 + $0x10] sm:$0xff] }
 0x3a3   :  { %2479 = vmatprep.subr.bf16.mxu0 %v4445_v1  ;;  %2520 = vmatprep.subr.bf16.mxu1 %v4448_v3 }
 0x3a6   :  { %2480 = vmatpush2.bf16.msra.mxu0 %v4443_v4  ;;  %2521 = vmatpush2.bf16.msra.mxu1 %v4446_v5 }
 0x3a7   :  { %2481 = vmatprep.subr.bf16.mxu0 %v4451_v6  ;;  %2522 = vmatprep.subr.bf16.mxu1 %v4454_v7 }
 0x3aa   :  { %2482 = vmatpush2.bf16.msra.mxu0 %v4449_v8  ;;  %2523 = vmatpush2.bf16.msra.mxu1 %v4452_v36 }
 0x3ab   :  { %2483 = vmatprep.subr.bf16.mxu0 %v4457_v9  ;;  %2524 = vmatprep.subr.bf16.mxu1 %v4460_v10  ;;  %v3874_v10 = vld [vmem:[%s5213_s3 + $0xc] sm:$0xf] }
 0x3ae   :  { %2484 = vmatpush2.bf16.msra.mxu0 %v4455_v12  ;;  %2525 = vmatpush2.bf16.msra.mxu1 %v4458_v13  ;;  %v2124_v12 = vrot.slane %v3874_v10, %v4961_v0  ;;  %v2128_v13 = vrot.slane %v3874_v10, %v4967_v2 }
 0x3af   :  { %2485 = vmatprep.subr.bf16.mxu0 %v4463_v15  ;;  %2526 = vmatprep.subr.bf16.mxu1 %v4466_v17 }
 0x3b2   :  { %2486 = vmatpush2.bf16.msra.mxu0 %v4461_v14  ;;  %2527 = vmatpush2.bf16.msra.mxu1 %v4464_v16 }
 0x3b3   :  { %2487 = vmatprep.subr.bf16.mxu0 %v4469_v19  ;;  %2528 = vmatprep.subr.bf16.mxu1 %v4472_v20 }
 0x3b6   :  { %2488 = vmatpush2.bf16.msra.mxu0 %v4467_v21  ;;  %2529 = vmatpush2.bf16.msra.mxu1 %v4470_v22 }
 0x3b7   :  { %2489 = vmatprep.subr.bf16.mxu0 %v4475_v23  ;;  %2530 = vmatprep.subr.bf16.mxu1 %v4478_v24 }
 0x3ba   :  { %2490 = vmatpush2.bf16.msra.mxu0 %v4473_v27  ;;  %2531 = vmatpush2.bf16.msra.mxu1 %v4476_v28  ;;  %v2136_v27 = vrot.slane %v3874_v10, %v4972_v11 }
 0x3bb   :  { %2491 = vmatprep.subr.bf16.mxu0 %v4481_v29  ;;  %2532 = vmatprep.subr.bf16.mxu1 %v4484_v30  ;;  %v2132_v29 = vrot.slane %v3874_v10, %v4976_v18 }
 0x3be   :  { %2492 = vmatpush2.bf16.msra.mxu0 %v4479_v31  ;;  %2533 = vmatpush2.bf16.msra.mxu1 %v4482_v32 }
 0x441   :  { %v1967_v38 = vpop.f32.mrf.mxu0  ;;  %v2008_v39 = vpop.f32.mrf.mxu1 }
 0x442   :  { %v1968_v40 = vadd.f32 %v1967_v38, %v1596_v34  ;;  %v2009_v55 = vadd.f32 %v2008_v39, %v1604_v52 }
 0x443   :  { %v1969_v41 = vpop.f32.mrf.mxu0  ;;  %v2010_v42 = vpop.f32.mrf.mxu1 }
 0x444   :  { %v3871_v43 = vmul.f32 -1.442695, %v1968_v40  ;;  %v1970_v44 = vadd.f32 %v1969_v41, %v1600_v35  ;;  %v2011_v51 = vadd.f32 %v2010_v42, %v1608_v50  ;;  %v2563_v40 = vld [vmem:[#allocation9 + $0x18] sm:$0xff] }
 0x445   :  { %v1971_v45 = vpop.f32.mrf.mxu0  ;;  %v2012_v46 = vpop.f32.mrf.mxu1 }
 0x446   :  { %4613 = vpow2.f32 %v3871_v43  ;;  %v3872_v47 = vmul.f32 -1.442695, %v1970_v44  ;;  %v3873_v53 = vmul.f32 -1.442695, %v2011_v51 }
 0x447   :  { %v1972_v48 = vpop.f32.mrf.mxu0  ;;  %v2013_v49 = vpop.f32.mrf.mxu1 }
 0x448   :  { %4615 = vpow2.f32 %v3872_v47  ;;  %v4856_v47 = vmov 1966171168  }
 0x449   :  { %4617 = vpow2.f32 %v3873_v53  ;;  %v2584_v48 = vunpack.c.l.s4 %v4856_v47 }
 0x44b   :  { %v2585_v49 = vunpack.c.0.s8 %v2584_v48 }
 0x44d   :  { %v2588_v51 = vsub.s32 %v2585_v49, %v4958_v63 }
 0x453   :  { %v4614_v54 = vpop.eup %4613 }
 0x454   :  { %v2018_v56 = vadd.f32 1.0, %v4614_v54 }
 0x455   :  { %v4616_v57 = vpop.eup %4615 }
 0x456   :  { %4619 = vrcp.f32 %v2018_v56  ;;  %v2024_v58 = vadd.f32 1.0, %v4616_v57  ;;  %v4618_v59 = vpop.eup %4617 }
 0x457   :  { %4621 = vtanh.f32 %v2009_v55  ;;  %v2031_v3 = vadd.f32 1.0, %v4618_v59  ;;  %v5004_v59 = vld [vmem:[%s5216_s6] sm:$0xff] }
 0x458   :  { %4623 = vrcp.f32 %v2024_v58 }
 0x459   :  { %4625 = vrcp.f32 %v2031_v3  ;;  %v5010_v3 = vld [vmem:[%s5216_s6 + $0x8] sm:$0xff] }
 0x463   :  { %v4620_v60 = vpop.eup %4619 }
 0x464   :  { %v4622_v62 = vpop.eup %4621 }
 0x465   :  { %v4624_v1 = vpop.eup %4623  ;;  %v2037_v4 = vmul.f32 %v4622_v62, %v4620_v60 }
 0x466   :  { %v2036_v5 = vmul.f32 %v4624_v1, %v2035_v61  ;;  %v4626_v7 = vpop.eup %4625 }
 0x468   :  { %v2038_v6 = vadd.f32 %v2037_v4, %v2036_v5 }
 0x46a   :  { %2044 = vst [vmem:[#allocation15 + $0x10] sm:$0xff] %v2038_v6  ;;  %4627 = vtanh.f32 %v2038_v6 }
 0x477   :  { %v4628_v8 = vpop.eup %4627 }
 0x478   :  { %v2040_v36 = vmul.f32 %v4628_v8, %v4626_v7 }
 0x47a   :  { %v2051_v9 = vpack.c.bf16 %v2040_v36, %v2040_v36  ;;  %2042 = vst [vmem:[#allocation13 + $0x10] sm:$0xff] %v2040_v36  ;;  %v5019_v36 = vld [vmem:[%s5216_s6 + $0x10] sm:$0xff] }
 0x47c   :  { %2494 = vmatmul.mubr.bf16.vlgmr.msra.gmra.mxu0 %v2051_v9  ;;  %2535 = vmatmul.mubr.bf16.vlgmr.msra.gmra.mxu1 %v2051_v9 }
 0x53c   :  { %v2495_v14 = vpop.f32.mrf.mxu0  ;;  %v2536_v15 = vpop.f32.mrf.mxu1 }
 0x53d   :  { %v2496_v16 = vadd.f32 %v2495_v14, %v2124_v12  ;;  %v2537_v32 = vadd.f32 %v2536_v15, %v2132_v29  ;;  %v5026_v14 = vld [vmem:[%s5216_s6 + $0x20] sm:$0xff] }
 0x53e   :  { %v2497_v17 = vpop.f32.mrf.mxu0  ;;  %v2538_v19 = vpop.f32.mrf.mxu1 }
 0x53f   :  { %v3939_v20 = vmul.f32 -1.442695, %v2496_v16  ;;  %v2498_v21 = vadd.f32 %v2497_v17, %v2128_v13  ;;  %v2539_v28 = vadd.f32 %v2538_v19, %v2136_v27  ;;  %v5033_v19 = vld [vmem:[%s5216_s6 + $0x18] sm:$0xff]  ;;  %v5047_v27 = vld [vmem:[%s5216_s6 + $0x30] sm:$0xff] }
 0x540   :  { %v2499_v22 = vpop.f32.mrf.mxu0  ;;  %v2540_v23 = vpop.f32.mrf.mxu1 }
 0x541   :  { %4629 = vpow2.f32 %v3939_v20  ;;  %v3940_v24 = vmul.f32 -1.442695, %v2498_v21  ;;  %v3941_v30 = vmul.f32 -1.442695, %v2539_v28  ;;  %v5040_v23 = vld [vmem:[%s5216_s6 + $0x28] sm:$0xff] }
 0x542   :  { %v2500_v25 = vpop.f32.mrf.mxu0  ;;  %v2541_v26 = vpop.f32.mrf.mxu1 }
 0x543   :  { %4631 = vpow2.f32 %v3940_v24 }
 0x544   :  { %4633 = vpow2.f32 %v3941_v30  ;;  %v5054_v30 = vld [vmem:[%s5216_s6 + $0x38] sm:$0xff] }
 0x54e   :  { %v4630_v31 = vpop.eup %4629 }
 0x54f   :  { %v2546_v33 = vadd.f32 1.0, %v4630_v31 }
 0x550   :  { %v4632_v34 = vpop.eup %4631 }
 0x551   :  { %4635 = vrcp.f32 %v2546_v33  ;;  %v2552_v35 = vadd.f32 1.0, %v4632_v34  ;;  %v4634_v38 = vpop.eup %4633 }
 0x552   :  { %4637 = vtanh.f32 %v2537_v32  ;;  %v2559_v43 = vadd.f32 1.0, %v4634_v38  ;;  %v5059_v38 = vsub.s32 %v4951_v37, %v4958_v63 }
 0x553   :  { %4639 = vrcp.f32 %v2552_v35 }
 0x554   :  { %4641 = vrcp.f32 %v2559_v43 }
 0x55e   :  { %v4636_v39 = vpop.eup %4635 }
 0x55f   :  { %v4638_v41 = vpop.eup %4637 }
 0x560   :  { %v4640_v42 = vpop.eup %4639  ;;  %v2565_v44 = vmul.f32 %v4638_v41, %v4636_v39 }
 0x561   :  { %v2564_v45 = vmul.f32 %v4640_v42, %v2563_v40  ;;  %v4642_v50 = vpop.eup %4641 }
 0x563   :  { %v2566_v46 = vadd.f32 %v2565_v44, %v2564_v45 }
 0x565   :  { %4643 = vtanh.f32 %v2566_v46  ;;  %2572 = vst [vmem:[#allocation15 + $0x18] sm:$0xff] %v2566_v46 }
 0x572   :  { %v4644_v52 = vpop.eup %4643 }
 0x573   :  { %v2568_v53 = vmul.f32 %v4644_v52, %v4642_v50 }
 0x575   :  { %v3061_v54 = vpack.c.bf16 %v2568_v53, %v2568_v53  ;;  %2570 = vst [vmem:[#allocation13 + $0x18] sm:$0xff] %v2568_v53  ;;  %v2589_v55 = vrot.slane %v2568_v53, %v2588_v51  ;;  %v2582_v56 = vcombine.high %v2568_v53, %v2568_v53 }
 0x577   :  { %3500 = vmatprep.mubr.bf16.mxu0 %v3061_v54  ;;  %3541 = vmatprep.mubr.bf16.mxu1 %v3061_v54  ;;  %v2605_v57 = vrot.slane %v2589_v55, %v2588_v51  ;;  %v2597_v58 = vcombine.high %v2589_v55, %v2589_v55  ;;  %v2596_v1 = vrot.slane %v2582_v56, %v2588_v51 }
 0x579   :  { %v2634_v60 = vrot.slane %v2605_v57, %v4961_v0  ;;  %v2619_v61 = vrot.slane %v2597_v58, %v2588_v51  ;;  %v2627_v62 = vcombine.high %v2605_v57, %v2605_v57  ;;  %v2612_v8 = vrot.slane %v2596_v1, %v2588_v51 }
 0x57a   :  { %v2598_v13 = vcombine.high %v2596_v1, %v2596_v1  ;;  %v2773_v58 = vsub.s32 4, %v4958_v63 }
 0x57b   :  { %v2671_v4 = vmul.f32 %v2634_v60, %v5004_v59  ;;  %v2638_v5 = vrot.slane %v2619_v61, %v4961_v0  ;;  %v2642_v7 = vrot.slane %v2627_v62, %v4961_v0  ;;  %v2650_v10 = vrot.slane %v2612_v8, %v4961_v0 }
 0x57c   :  { %v2629_v12 = vcombine.high %v2619_v61, %v2619_v61  ;;  %v2626_v17 = vrot.slane %v2598_v13, %v2588_v51  ;;  %v2628_v22 = vcombine.high %v2612_v8, %v2612_v8  ;;  %v2781_v60 = vsub.s32 6, %v4958_v63 }
 0x57d   :  { %2679 = vadd.xlane.f32.xlu0 %v2671_v4  ;;  %v2672_v6 = vmul.f32 %v2638_v5, %v5010_v3  ;;  %v2673_v9 = vmul.f32 %v2642_v7, %v5019_v36  ;;  %v2675_v15 = vmul.f32 %v2650_v10, %v5026_v14  ;;  %v2777_v5 = vsub.s32 5, %v4958_v63 }
 0x57e   :  { %v2646_v16 = vrot.slane %v2629_v12, %v4961_v0  ;;  %v2654_v21 = vrot.slane %v2626_v17, %v4961_v0  ;;  %v2658_v25 = vrot.slane %v2628_v22, %v4961_v0  ;;  %v2630_v26 = vcombine.high %v2626_v17, %v2626_v17 }
 0x57f   :  { %2681 = vadd.xlane.f32.xlu1 %v2672_v6  ;;  %v2785_v17 = vsub.s32 7, %v4958_v63  ;;  %v4559_v63 = vld [vmem:[#allocation11 + $0x164] ss:$16 sps:$4 sm:$0xff]  }
 0x580   :  { %v2674_v20 = vmul.f32 %v2646_v16, %v5033_v19  ;;  %v2676_v24 = vmul.f32 %v2654_v21, %v5040_v23  ;;  %v2677_v28 = vmul.f32 %v2658_v25, %v5047_v27  ;;  %v2662_v29 = vrot.slane %v2630_v26, %v4961_v0 }
 0x582   :  { %v2678_v31 = vmul.f32 %v2662_v29, %v5054_v30 }
 0x583   :  { %2683 = vadd.xlane.f32.xlu1 %v2673_v9 }
 0x587   :  { %2687 = vadd.xlane.f32.xlu1 %v2675_v15 }
 0x58b   :  { %2685 = vadd.xlane.f32.xlu1 %v2674_v20 }
 0x58f   :  { %2689 = vadd.xlane.f32.xlu1 %v2676_v24 }
 0x593   :  { %2691 = vadd.xlane.f32.xlu1 %v2677_v28 }
 0x597   :  { %2693 = vadd.xlane.f32.xlu1 %v2678_v31 }
 0x606   :  { %v2680_v39 = vpop.xlane.xlu0 %2679 }
 0x607   :  { %v2706_v43 = vrot.slane %v2680_v39, %v5059_v38 }
 0x608   :  { %v2682_v32 = vpop.xlane.xlu1 %2681 }
 0x609   :  { %v2710_v40 = vrot.slane %v2682_v32, %v5059_v38 }
 0x60b   :  { %v2736_v45 = vsel %vm2735_vm8, %v2710_v40, %v2706_v43 }
 0x60c   :  { %v2684_v33 = vpop.xlane.xlu1 %2683 }
 0x60d   :  { %v2714_v41 = vrot.slane %v2684_v33, %v5059_v38 }
 0x60f   :  { %v2738_v46 = vsel %vm2737_vm9, %v2714_v41, %v2736_v45 }
 0x610   :  { %v2688_v34 = vpop.xlane.xlu1 %2687 }
 0x611   :  { %v2722_v49 = vrot.slane %v2688_v34, %v5059_v38 }
 0x614   :  { %v2686_v35 = vpop.xlane.xlu1 %2685 }
 0x615   :  { %v2718_v44 = vrot.slane %v2686_v35, %v5059_v38 }
 0x617   :  { %v2740_v37 = vsel %vm2739_vm10, %v2718_v44, %v2738_v46 }
 0x618   :  { %v2690_v42 = vpop.xlane.xlu1 %2689  ;;  %v2742_v52 = vsel %vm2741_vm11, %v2722_v49, %v2740_v37 }
 0x619   :  { %v2726_v48 = vrot.slane %v2690_v42, %v5059_v38 }
 0x61b   :  { %v2744_v54 = vsel %vm2743_vm12, %v2726_v48, %v2742_v52 }
 0x61c   :  { %v2692_v47 = vpop.xlane.xlu1 %2691 }
 0x61d   :  { %v2730_v50 = vrot.slane %v2692_v47, %v5059_v38 }
 0x61f   :  { %v2746_v55 = vsel %vm2745_vm13, %v2730_v50, %v2744_v54 }
 0x620   :  { %v2694_v51 = vpop.xlane.xlu1 %2693 }
 0x621   :  { %v2734_v53 = vrot.slane %v2694_v51, %v5059_v38 }
 0x623   :  { %v2748_v56 = vsel %vm2747_vm14, %v2734_v53, %v2746_v55 }
 0x624   :  { %v2751_v57 = vsel %vm2750_vm15, %v2748_v56, -inf }
 0x625   :  { %2752 = vmax.xlane.f32.xlu1 %v2751_v57 }
 0x6ae   :  { %v2753_v61 = vpop.xlane.xlu1 %2752 }
 0x6af   :  { %v2758_v62 = vrot.slane %v2753_v61, %v4961_v0  ;;  %v2762_v1 = vrot.slane %v2753_v61, %v4967_v2  ;;  %v2766_v4 = vrot.slane %v2753_v61, %v4976_v18  ;;  %v2774_v6 = vrot.slane %v2753_v61, %v2773_v58 }
 0x6b0   :  { %v2770_v7 = vrot.slane %v2753_v61, %v4972_v11  ;;  %v2782_v12 = vrot.slane %v2753_v61, %v2781_v60  ;;  %v2778_v20 = vrot.slane %v2753_v61, %v2777_v5  ;;  %v2786_v26 = vrot.slane %v2753_v61, %v2785_v17 }
 0x6b1   :  { %v2795_v8 = vsub.f32 %v2680_v39, %v2758_v62  ;;  %v2796_v9 = vsub.f32 %v2682_v32, %v2762_v1  ;;  %v2797_v10 = vsub.f32 %v2684_v33, %v2766_v4  ;;  %v2799_v13 = vsub.f32 %v2688_v34, %v2774_v6 }
 0x6b2   :  { %v2798_v21 = vsub.f32 %v2686_v35, %v2770_v7  ;;  %v2801_v24 = vsub.f32 %v2692_v47, %v2782_v12  ;;  %v2800_v28 = vsub.f32 %v2690_v42, %v2778_v20  ;;  %v2802_v32 = vsub.f32 %v2694_v51, %v2786_v26  ;;  %v4488_v20 = vld [vmem:[#allocation11 + $0xe8] ss:$16 sps:$4 sm:$0xff]   ;;  %v4499_v26 = vld [vmem:[#allocation11 + $0xa4] ss:$16 sps:$4 sm:$0xff]  }
 0x6b3   :  { %v2803_v15 = vmul.f32 1.442695, %v2795_v8  ;;  %v2805_v16 = vmul.f32 1.442695, %v2796_v9  ;;  %v2807_v22 = vmul.f32 1.442695, %v2797_v10 }
 0x6b4   :  { %v2811_v25 = vmul.f32 1.442695, %v2799_v13  ;;  %v2809_v29 = vmul.f32 1.442695, %v2798_v21  ;;  %v2815_v31 = vmul.f32 1.442695, %v2801_v24 }
 0x6b5   :  { %4645 = vpow2.f32 %v2803_v15  ;;  %v2813_v33 = vmul.f32 1.442695, %v2800_v28  ;;  %v2817_v34 = vmul.f32 1.442695, %v2802_v32  ;;  %v4485_v15 = vld [vmem:[#allocation11 + $0xe0] ss:$16 sps:$4 sm:$0xff]  }
 0x6b6   :  { %4647 = vpow2.f32 %v2805_v16  ;;  %v4487_v16 = vld [vmem:[#allocation11 + $0xe4] ss:$16 sps:$4 sm:$0xff]   ;;  %v4490_v21 = vld [vmem:[#allocation11 + $0xec] ss:$16 sps:$4 sm:$0xff]  }
 0x6b7   :  { %4649 = vpow2.f32 %v2807_v22  ;;  %v4493_v22 = vld [vmem:[#allocation11 + $0xc4] ss:$16 sps:$4 sm:$0xff]   ;;  %3468 = vmatprep.subr.bf16.mxu0 %v4487_v16  ;;  %v4496_v24 = vld [vmem:[#allocation11 + $0xcc] ss:$16 sps:$4 sm:$0xff]   ;;  %3509 = vmatprep.subr.bf16.mxu1 %v4490_v21 }
 0x6b8   :  { %4651 = vpow2.f32 %v2811_v25  ;;  %3469 = vmatpush1.bf16.msra.mxu0 %v4485_v15  ;;  %v4491_v25 = vld [vmem:[#allocation11 + $0xc0] ss:$16 sps:$4 sm:$0xff]   ;;  %3510 = vmatpush1.bf16.msra.mxu1 %v4488_v20  ;;  %v4502_v28 = vld [vmem:[#allocation11 + $0xac] ss:$16 sps:$4 sm:$0xff]   ;;  %v4505_v32 = vld [vmem:[#allocation11 + $0x84] ss:$16 sps:$4 sm:$0xff]  }
 0x6b9   :  { %4653 = vpow2.f32 %v2809_v29  ;;  %3470 = vmatprep.subr.bf16.mxu0 %v4493_v22  ;;  %3511 = vmatprep.subr.bf16.mxu1 %v4496_v24  ;;  %v4497_v29 = vld [vmem:[#allocation11 + $0xa0] ss:$16 sps:$4 sm:$0xff]   ;;  %v4530_v15 = vld [vmem:[#allocation11 + $0x8] ss:$16 sps:$4 sm:$0xff]   ;;  %v4535_v21 = vld [vmem:[#allocation11 + $0x1e4] ss:$16 sps:$4 sm:$0xff]  }
 0x6ba   :  { %4655 = vpow2.f32 %v2815_v31  ;;  %v4500_v31 = vld [vmem:[#allocation11 + $0xa8] ss:$16 sps:$4 sm:$0xff]   ;;  %v4533_v22 = vld [vmem:[#allocation11 + $0x1e0] ss:$16 sps:$4 sm:$0xff]  }
 0x6bb   :  { %4657 = vpow2.f32 %v2813_v33  ;;  %v4508_v33 = vld [vmem:[#allocation11 + $0x8c] ss:$16 sps:$4 sm:$0xff]   ;;  %v4536_v24 = vld [vmem:[#allocation11 + $0x1e8] ss:$16 sps:$4 sm:$0xff]  }
 0x6bc   :  { %4659 = vpow2.f32 %v2817_v34  ;;  %3471 = vmatpush1.bf16.msra.mxu0 %v4491_v25  ;;  %v4503_v34 = vld [vmem:[#allocation11 + $0x80] ss:$16 sps:$4 sm:$0xff]  }
 0x6bd   :  { %3472 = vmatprep.subr.bf16.mxu0 %v4499_v26  ;;  %v4539_v26 = vld [vmem:[#allocation11 + $0x1c0] ss:$16 sps:$4 sm:$0xff]  }
 0x6c0   :  { %3473 = vmatpush1.bf16.msra.mxu0 %v4497_v29 }
 0x6c1   :  { %3474 = vmatprep.subr.bf16.mxu0 %v4505_v32  ;;  %v4545_v32 = vld [vmem:[#allocation11 + $0x1a0] ss:$16 sps:$4 sm:$0xff]  }
 0x6c2   :  { %v5093_v35 = vpop.eup %4645 }
 0x6c3   :  { %v5095_v39 = vpop.eup %4647  ;;  %2828 = vperm.xlu1 %4068, %v5093_v35  }
 0x6c4   :  { %2831 = vperm.xlu0 %4067, %v5095_v39   ;;  %v5099_v40 = vpop.eup %4649  ;;  %3475 = vmatpush1.bf16.msra.mxu0 %v4503_v34  ;;  %v4553_v34 = vld [vmem:[#allocation11 + $0x184] ss:$16 sps:$4 sm:$0xff]  }
 0x6c5   :  { %v5101_v41 = vpop.eup %4651 }
 0x6c6   :  { %v5105_v42 = vpop.eup %4653 }
 0x6c7   :  { %2834 = vperm.xlu1 %4068, %v5099_v40   ;;  %v5107_v43 = vpop.eup %4655 }
 0x6c8   :  { %2840 = vperm.xlu0 %4067, %v5101_v41   ;;  %v5111_v44 = vpop.eup %4657 }
 0x6c9   :  { %v5114_v45 = vpop.eup %4659 }
 0x6cb   :  { %2837 = vperm.xlu1 %4068, %v5105_v42  }
 0x6cc   :  { %2846 = vperm.xlu0 %4067, %v5107_v43  }
 0x6cf   :  { %2843 = vperm.xlu1 %4068, %v5111_v44  }
 0x6d3   :  { %2849 = vperm.xlu1 %4068, %v5114_v45  }
 0x73e   :  { %v2829_v46 = vpop.permute.xlu1 %2828 }
 0x73f   :  { %v2832_v47 = vpop.permute.xlu0 %2831  ;;  %v2854_v49 = vrot.slane %v2829_v46, %v5059_v38  ;;  %v4506_v46 = vld [vmem:[#allocation11 + $0x88] ss:$16 sps:$4 sm:$0xff]  }
 0x740   :  { %v2858_v48 = vrot.slane %v2832_v47, %v5059_v38  ;;  %v4511_v47 = vld [vmem:[#allocation11 + $0x64] ss:$16 sps:$4 sm:$0xff]  }
 0x741   :  { %3476 = vmatprep.subr.bf16.mxu0 %v4511_v47  ;;  %v4551_v47 = vld [vmem:[#allocation11 + $0x180] ss:$16 sps:$4 sm:$0xff]  }
 0x742   :  { %v2835_v37 = vpop.permute.xlu1 %2834  ;;  %v2883_v53 = vsel %vm2735_vm8, %v2858_v48, %v2854_v49  ;;  %v4509_v48 = vld [vmem:[#allocation11 + $0x60] ss:$16 sps:$4 sm:$0xff]   ;;  %v4512_v49 = vld [vmem:[#allocation11 + $0x68] ss:$16 sps:$4 sm:$0xff]  }
 0x743   :  { %v2862_v50 = vrot.slane %v2835_v37, %v5059_v38  ;;  %v2841_v51 = vpop.permute.xlu0 %2840  ;;  %v4514_v37 = vld [vmem:[#allocation11 + $0x6c] ss:$16 sps:$4 sm:$0xff]   ;;  %3477 = vmatpush1.bf16.msra.mxu0 %v4509_v48  ;;  %v4560_v48 = vld [vmem:[#allocation11 + $0x168] ss:$16 sps:$4 sm:$0xff]  }
 0x744   :  { %v2870_v57 = vrot.slane %v2841_v51, %v5059_v38 }
 0x745   :  { %v2884_v55 = vsel %vm2737_vm9, %v2862_v50, %v2883_v53 }
 0x746   :  { %v2838_v52 = vpop.permute.xlu1 %2837 }
 0x747   :  { %v2866_v54 = vrot.slane %v2838_v52, %v5059_v38  ;;  %v2847_v62 = vpop.permute.xlu0 %2846 }
 0x748   :  { %v2878_v7 = vrot.slane %v2847_v62, %v5059_v38  ;;  %v4515_v62 = vld [vmem:[#allocation11 + $0x40] ss:$16 sps:$4 sm:$0xff]  }
 0x749   :  { %v2885_v56 = vsel %vm2739_vm10, %v2866_v54, %v2884_v55 }
 0x74a   :  { %v2844_v61 = vpop.permute.xlu1 %2843  ;;  %v2886_v4 = vsel %vm2741_vm11, %v2870_v57, %v2885_v56  ;;  %v4517_v57 = vld [vmem:[#allocation11 + $0x44] ss:$16 sps:$4 sm:$0xff]  }
 0x74b   :  { %v2874_v1 = vrot.slane %v2844_v61, %v5059_v38  ;;  %v4520_v61 = vld [vmem:[#allocation11 + $0x4c] ss:$16 sps:$4 sm:$0xff]   ;;  %3478 = vmatprep.subr.bf16.mxu0 %v4517_v57 }
 0x74c   :  { %3479 = vmatpush1.bf16.msra.mxu0 %v4515_v62  ;;  %v4580_v57 = vld [vmem:[#allocation11 + $0x10c] ss:$16 sps:$4 sm:$0xff]   ;;  %v4578_v62 = vld [vmem:[#allocation11 + $0x108] ss:$16 sps:$4 sm:$0xff]  }
 0x74d   :  { %v2887_v6 = vsel %vm2743_vm12, %v2874_v1, %v2886_v4  ;;  %v4518_v1 = vld [vmem:[#allocation11 + $0x48] ss:$16 sps:$4 sm:$0xff]  }
 0x74e   :  { %v2850_v8 = vpop.permute.xlu1 %2849  ;;  %v2888_v10 = vsel %vm2745_vm13, %v2878_v7, %v2887_v6  ;;  %v4526_v7 = vld [vmem:[#allocation11 + $0x2c] ss:$16 sps:$4 sm:$0xff]  }
 0x74f   :  { %v2882_v9 = vrot.slane %v2850_v8, %v5059_v38  ;;  %v4494_v38 = vld [vmem:[#allocation11 + $0xc8] ss:$16 sps:$4 sm:$0xff]   ;;  %v4521_v8 = vld [vmem:[#allocation11 + $0x20] ss:$16 sps:$4 sm:$0xff]  }
 0x750   :  { %3512 = vmatpush1.bf16.msra.mxu1 %v4494_v38  ;;  %v4541_v38 = vld [vmem:[#allocation11 + $0x1c4] ss:$16 sps:$4 sm:$0xff]  }
 0x751   :  { %v2889_v12 = vsel %vm2747_vm14, %v2882_v9, %v2888_v10  ;;  %3513 = vmatprep.subr.bf16.mxu1 %v4502_v28  ;;  %v4524_v9 = vld [vmem:[#allocation11 + $0x28] ss:$16 sps:$4 sm:$0xff]  }
 0x752   :  { %v2891_v13 = vsel %vm2750_vm15, %v2889_v12, 0.0  ;;  %v4529_v12 = vld [vmem:[#allocation11 + $0x4] ss:$16 sps:$4 sm:$0xff]   ;;  %v4542_v28 = vld [vmem:[#allocation11 + $0x1c8] ss:$16 sps:$4 sm:$0xff]  }
 0x753   :  { %2892 = vadd.xlane.f32.xlu0 %v2891_v13  ;;  %v4532_v13 = vld [vmem:[#allocation11 + $0xc] ss:$16 sps:$4 sm:$0xff]  }
 0x754   :  { %3514 = vmatpush1.bf16.msra.mxu1 %v4500_v31  ;;  %v4547_v31 = vld [vmem:[#allocation11 + $0x1a4] ss:$16 sps:$4 sm:$0xff]  }
 0x755   :  { %3515 = vmatprep.subr.bf16.mxu1 %v4508_v33  ;;  %v4548_v33 = vld [vmem:[#allocation11 + $0x1a8] ss:$16 sps:$4 sm:$0xff]  }
 0x758   :  { %3516 = vmatpush1.bf16.msra.mxu1 %v4506_v46  ;;  %v4556_v46 = vld [vmem:[#allocation11 + $0x18c] ss:$16 sps:$4 sm:$0xff]  }
 0x759   :  { %3517 = vmatprep.subr.bf16.mxu1 %v4514_v37  ;;  %v4554_v37 = vld [vmem:[#allocation11 + $0x188] ss:$16 sps:$4 sm:$0xff]  }
 0x75c   :  { %3518 = vmatpush1.bf16.msra.mxu1 %v4512_v49  ;;  %v4565_v49 = vld [vmem:[#allocation11 + $0x144] ss:$16 sps:$4 sm:$0xff]  }
 0x75d   :  { %3519 = vmatprep.subr.bf16.mxu1 %v4520_v61  ;;  %v4575_v61 = vld [vmem:[#allocation11 + $0x100] ss:$16 sps:$4 sm:$0xff]  }
 0x760   :  { %3520 = vmatpush1.bf16.msra.mxu1 %v4518_v1 }
 0x761   :  { %3521 = vmatprep.subr.bf16.mxu1 %v4526_v7 }
 0x764   :  { %3522 = vmatpush1.bf16.msra.mxu1 %v4524_v9 }
 0x765   :  { %3523 = vmatprep.subr.bf16.mxu1 %v4532_v13 }
 0x768   :  { %3524 = vmatpush1.bf16.msra.mxu1 %v4530_v15 }
 0x7dc   :  { %v2893_v50 = vpop.xlane.xlu0 %2892 }
 0x7dd   :  { %4661 = vrcp.f32 %v2893_v50  ;;  %v4563_v50 = vld [vmem:[#allocation11 + $0x140] ss:$16 sps:$4 sm:$0xff]  }
 0x7ea   :  { %v4662_v51 = vpop.eup %4661 }
 0x7eb   :  { %v2899_v52 = vrot.slane %v4662_v51, %v4961_v0  ;;  %v2903_v54 = vrot.slane %v4662_v51, %v4967_v2  ;;  %v2907_v56 = vrot.slane %v4662_v51, %v4976_v18  ;;  %v2911_v6 = vrot.slane %v4662_v51, %v4972_v11 }
 0x7ec   :  { %v2915_v10 = vrot.slane %v4662_v51, %v2773_v58  ;;  %v2919_v20 = vrot.slane %v4662_v51, %v2777_v5  ;;  %v2923_v25 = vrot.slane %v4662_v51, %v2781_v60  ;;  %v2927_v29 = vrot.slane %v4662_v51, %v2785_v17  ;;  %v4562_v17 = vld [vmem:[#allocation11 + $0x16c] ss:$16 sps:$4 sm:$0xff]   ;;  %v4566_v51 = vld [vmem:[#allocation11 + $0x148] ss:$16 sps:$4 sm:$0xff]  }
 0x7ed   :  { %v2936_v53 = vmul.f32 %v5093_v35, %v2899_v52  ;;  %v2937_v55 = vmul.f32 %v5095_v39, %v2903_v54  ;;  %v2938_v4 = vmul.f32 %v5099_v40, %v2907_v56  ;;  %v4523_v35 = vld [vmem:[#allocation11 + $0x24] ss:$16 sps:$4 sm:$0xff]   ;;  %v2939_v39 = vmul.f32 %v5105_v42, %v2911_v6  ;;  %v4527_v40 = vld [vmem:[#allocation11] ss:$16 sps:$4 sm:$0xff]   ;;  %v4538_v42 = vld [vmem:[#allocation11 + $0x1ec] ss:$16 sps:$4 sm:$0xff]  }
 0x7ee   :  { %3480 = vmatprep.subr.bf16.mxu0 %v4523_v35  ;;  %v2940_v16 = vmul.f32 %v5101_v41, %v2915_v10  ;;  %3525 = vmatprep.subr.bf16.mxu1 %v4538_v42  ;;  %v2941_v58 = vmul.f32 %v5111_v44, %v2919_v20  ;;  %v4544_v41 = vld [vmem:[#allocation11 + $0x1cc] ss:$16 sps:$4 sm:$0xff]   ;;  %v2942_v5 = vmul.f32 %v5107_v43, %v2923_v25  ;;  %v4557_v43 = vld [vmem:[#allocation11 + $0x160] ss:$16 sps:$4 sm:$0xff]   ;;  %v4571_v52 = vld [vmem:[#allocation11 + $0x124] ss:$16 sps:$4 sm:$0xff]  }
 0x7ef   :  { %2946 = vperm.xlu1 %4068, %v2936_v53   ;;  %3481 = vmatpush1.bf16.msra.mxu0 %v4521_v8  ;;  %v4550_v44 = vld [vmem:[#allocation11 + $0x1ac] ss:$16 sps:$4 sm:$0xff]   ;;  %v2943_v60 = vmul.f32 %v5114_v45, %v2927_v29  ;;  %v4569_v53 = vld [vmem:[#allocation11 + $0x120] ss:$16 sps:$4 sm:$0xff]   ;;  %v4577_v56 = vld [vmem:[#allocation11 + $0x104] ss:$16 sps:$4 sm:$0xff]  }
 0x7f0   :  { %3482 = vmatprep.subr.bf16.mxu0 %v4529_v12  ;;  %3526 = vmatpush2.bf16.msra.mxu1 %v4536_v24  ;;  %v4568_v45 = vld [vmem:[#allocation11 + $0x14c] ss:$16 sps:$4 sm:$0xff]  }
 0x7f1   :  { %3527 = vmatprep.subr.bf16.mxu1 %v4544_v41  ;;  %v4574_v54 = vld [vmem:[#allocation11 + $0x12c] ss:$16 sps:$4 sm:$0xff]  }
 0x7f3   :  { %2951 = vperm.xlu1 %4068, %v2937_v55   ;;  %3483 = vmatpush1.bf16.msra.mxu0 %v4527_v40  ;;  %v4572_v55 = vld [vmem:[#allocation11 + $0x128] ss:$16 sps:$4 sm:$0xff]  }
 0x7f4   :  { %3484 = vmatprep.subr.bf16.mxu0 %v4535_v21  ;;  %3528 = vmatpush2.bf16.msra.mxu1 %v4542_v28 }
 0x7f5   :  { %3529 = vmatprep.subr.bf16.mxu1 %v4550_v44 }
 0x7f7   :  { %2956 = vperm.xlu1 %4068, %v2938_v4   ;;  %3485 = vmatpush2.bf16.msra.mxu0 %v4533_v22 }
 0x7f8   :  { %3486 = vmatprep.subr.bf16.mxu0 %v4541_v38  ;;  %3530 = vmatpush2.bf16.msra.mxu1 %v4548_v33 }
 0x7f9   :  { %3531 = vmatprep.subr.bf16.mxu1 %v4556_v46 }
 0x7fb   :  { %2961 = vperm.xlu1 %4068, %v2939_v39   ;;  %3487 = vmatpush2.bf16.msra.mxu0 %v4539_v26 }
 0x7fc   :  { %3488 = vmatprep.subr.bf16.mxu0 %v4547_v31  ;;  %3532 = vmatpush2.bf16.msra.mxu1 %v4554_v37 }
 0x7fd   :  { %3533 = vmatprep.subr.bf16.mxu1 %v4562_v17 }
 0x7ff   :  { %2966 = vperm.xlu1 %4068, %v2940_v16   ;;  %3489 = vmatpush2.bf16.msra.mxu0 %v4545_v32 }
 0x800   :  { %3490 = vmatprep.subr.bf16.mxu0 %v4553_v34  ;;  %3534 = vmatpush2.bf16.msra.mxu1 %v4560_v48 }
 0x801   :  { %3535 = vmatprep.subr.bf16.mxu1 %v4568_v45 }
 0x803   :  { %2971 = vperm.xlu1 %4068, %v2941_v58   ;;  %3491 = vmatpush2.bf16.msra.mxu0 %v4551_v47 }
 0x804   :  { %3492 = vmatprep.subr.bf16.mxu0 %v4559_v63  ;;  %3536 = vmatpush2.bf16.msra.mxu1 %v4566_v51 }
 0x805   :  { %3537 = vmatprep.subr.bf16.mxu1 %v4574_v54 }
 0x807   :  { %2976 = vperm.xlu1 %4068, %v2942_v5   ;;  %3493 = vmatpush2.bf16.msra.mxu0 %v4557_v43 }
 0x808   :  { %3494 = vmatprep.subr.bf16.mxu0 %v4565_v49  ;;  %3538 = vmatpush2.bf16.msra.mxu1 %v4572_v55 }
 0x809   :  { %3539 = vmatprep.subr.bf16.mxu1 %v4580_v57 }
 0x80b   :  { %2981 = vperm.xlu1 %4068, %v2943_v60   ;;  %3495 = vmatpush2.bf16.msra.mxu0 %v4563_v50 }
 0x80c   :  { %3496 = vmatprep.subr.bf16.mxu0 %v4571_v52  ;;  %3540 = vmatpush2.bf16.msra.mxu1 %v4578_v62 }
 0x80f   :  { %3497 = vmatpush2.bf16.msra.mxu0 %v4569_v53 }
 0x810   :  { %3498 = vmatprep.subr.bf16.mxu0 %v4577_v56 }
 0x813   :  { %3499 = vmatpush2.bf16.msra.mxu0 %v4575_v61 }
 0x86a   :  { %v2947_v1 = vpop.permute.xlu1 %2946 }
 0x86b   :  { %v2984_v8 = vmul.f32 %v2947_v1, %v5004_v59 }
 0x86d   :  { %v2992_v13 = vrot.slane %v2984_v8, 4 }
 0x86e   :  { %v2952_v4 = vpop.permute.xlu1 %2951 }
 0x86f   :  { %v2985_v35 = vmul.f32 %v2952_v4, %v5010_v3  ;;  %v2993_v42 = vadd.f32 %v2992_v13, %v2984_v8 }
 0x871   :  { %v2998_v39 = vrot.slane %v2985_v35, 4  ;;  %v2994_v38 = vrot.slane %v2993_v42, 2 }
 0x872   :  { %v2957_v6 = vpop.permute.xlu1 %2956 }
 0x873   :  { %v2986_v7 = vmul.f32 %v2957_v6, %v5019_v36  ;;  %v2999_v16 = vadd.f32 %v2998_v39, %v2985_v35  ;;  %v2995_v44 = vadd.f32 %v2994_v38, %v2993_v42 }
 0x875   :  { %v3004_v12 = vrot.slane %v2986_v7, 4  ;;  %v3000_v58 = vrot.slane %v2999_v16, 2  ;;  %v2996_v43 = vrot.slane %v2995_v44, 1 }
 0x876   :  { %v2962_v9 = vpop.permute.xlu1 %2961 }
 0x877   :  { %v2987_v10 = vmul.f32 %v2962_v9, %v5033_v19  ;;  %v3005_v21 = vadd.f32 %v3004_v12, %v2986_v7  ;;  %v3001_v5 = vadd.f32 %v3000_v58, %v2999_v16  ;;  %v2997_v55 = vadd.f32 %v2996_v43, %v2995_v44 }
 0x879   :  { %v3010_v40 = vrot.slane %v2987_v10, 4  ;;  %v3006_v25 = vrot.slane %v3005_v21, 2  ;;  %v3002_v47 = vrot.slane %v3001_v5, 1 }
 0x87a   :  { %v2967_v15 = vpop.permute.xlu1 %2966 }
 0x87b   :  { %v2988_v20 = vmul.f32 %v2967_v15, %v5026_v14  ;;  %v3011_v22 = vadd.f32 %v3010_v40, %v2987_v10  ;;  %v3007_v14 = vadd.f32 %v3006_v25, %v3005_v21  ;;  %v3003_v51 = vadd.f32 %v3002_v47, %v3001_v5  ;;  %v3126_v15 = vld [vmem:[%s5218_s8] sm:$0xf]  ;;  %s4857_s8 = smov [#allocation13]  }
 0x87c   :  { %v3131_v16 = vrot.slane %v3126_v15, %v4961_v0  ;;  %v3135_v21 = vrot.slane %v3126_v15, %v4967_v2  ;;  %v3143_v42 = vrot.slane %v3126_v15, %v4972_v11  ;;  %s3598_s7 = sshll.u32 %s4857_s8, 4  ;;  %s3599_s7 = int_to_ptr.vmem [resolvable:$true] %s3598_s7 }
 0x87d   :  { %v3016_v24 = vrot.slane %v2988_v20, 4  ;;  %v3012_v41 = vrot.slane %v3011_v22, 2  ;;  %v3008_v17 = vrot.slane %v3007_v14, 1  ;;  %v3048_v1 = vsel %vm2735_vm8, %v3003_v51, %v2997_v55  ;;  %s4773_s20 = scalar_lea.vmem %s3599_s7, 512  ;;  %p4778_p12 = scmp.lt.s32.totalorder %s3599_s7, %s3599_s7 }
 0x87e   :  { %v2972_v3 = vpop.permute.xlu1 %2971  ;;  %p4774_p11 = scmp.ne.s32.totalorder %s3599_s7, %s4773_s20  ;;  %p4779_p13 = scmp.lt.s32.totalorder %s4773_s20, %s4773_s20 }
 0x87f   :  { %v3017_v36 = vadd.f32 %v3016_v24, %v2988_v20  ;;  %v2989_v59 = vmul.f32 %v2972_v3, %v5040_v23  ;;  %v3013_v32 = vadd.f32 %v3012_v41, %v3011_v22  ;;  %v3009_v54 = vadd.f32 %v3008_v17, %v3007_v14 }
 0x880   :  { %v3139_v20 = vrot.slane %v3126_v15, %v4976_v18  ;;  %p4780_p0 = por %p4779_p13, %p4778_p12 }
 0x881   :  { %v3022_v19 = vrot.slane %v2989_v59, 4  ;;  %v3018_v26 = vrot.slane %v3017_v36, 2  ;;  %v3014_v48 = vrot.slane %v3013_v32, 1  ;;  %v3049_v6 = vsel %vm2737_vm9, %v3009_v54, %v3048_v1 }
 0x882   :  { %v2977_v28 = vpop.permute.xlu1 %2976  ;;  %p4781_p1 = pnand %p4780_p0, %p4774_p11 }
 0x883   :  { %v3023_v29 = vadd.f32 %v3022_v19, %v2989_v59  ;;  %v2990_v31 = vmul.f32 %v2977_v28, %v5047_v27  ;;  %v3019_v34 = vadd.f32 %v3018_v26, %v3017_v36  ;;  %v3015_v56 = vadd.f32 %v3014_v48, %v3013_v32 }
 0x885   :  { %v3024_v33 = vrot.slane %v3023_v29, 2  ;;  %v3028_v60 = vrot.slane %v2990_v31, 4  ;;  %v3020_v50 = vrot.slane %v3019_v34, 1  ;;  %v3050_v7 = vsel %vm2739_vm10, %v3015_v56, %v3049_v6 }
 0x886   :  { %v2982_v46 = vpop.permute.xlu1 %2981 }
 0x887   :  { %v3025_v37 = vadd.f32 %v3024_v33, %v3023_v29  ;;  %v3029_v23 = vadd.f32 %v3028_v60, %v2990_v31  ;;  %v2991_v63 = vmul.f32 %v2982_v46, %v5054_v30  ;;  %v3021_v62 = vadd.f32 %v3020_v50, %v3019_v34 }
 0x889   :  { %v3030_v49 = vrot.slane %v3029_v23, 2  ;;  %v3034_v45 = vrot.slane %v2991_v63, 4  ;;  %v3026_v27 = vrot.slane %v3025_v37, 1  ;;  %v3051_v9 = vsel %vm2741_vm11, %v3021_v62, %v3050_v7 }
 0x88b   :  { %v3031_v52 = vadd.f32 %v3030_v49, %v3029_v23  ;;  %v3035_v53 = vadd.f32 %v3034_v45, %v2991_v63  ;;  %v3027_v4 = vadd.f32 %v3026_v27, %v3025_v37 }
 0x88d   :  { %v3032_v57 = vrot.slane %v3031_v52, 1  ;;  %v3036_v61 = vrot.slane %v3035_v53, 2  ;;  %v3052_v39 = vsel %vm2743_vm12, %v3027_v4, %v3051_v9 }
 0x88f   :  { %v3037_v30 = vadd.f32 %v3036_v61, %v3035_v53  ;;  %v3033_v35 = vadd.f32 %v3032_v57, %v3031_v52 }
 0x891   :  { %v3038_v8 = vrot.slane %v3037_v30, 1  ;;  %v3053_v12 = vsel %vm2745_vm13, %v3033_v35, %v3052_v39 }
 0x893   :  { %v3039_v10 = vadd.f32 %v3038_v8, %v3037_v30 }
 0x895   :  { %v3054_v13 = vsel %vm2747_vm14, %v3039_v10, %v3053_v12 }
 0x896   :  { %v3060_v40 = vpack.c.bf16 %v3054_v13, %v3054_v13 }
 0x898   :  { %3501 = vmatmul.mubr.bf16.vlgmr.msra.gmra.mxu0 %v3060_v40  ;;  %3542 = vmatmul.mubr.bf16.vlgmr.msra.gmra.mxu1 %v3060_v40 }
 0x958   :  { %v3502_v22 = vpop.f32.mrf.mxu0  ;;  %v3543_v24 = vpop.f32.mrf.mxu1 }
 0x959   :  { %v5175_v36 = vadd.f32 %v3502_v22, %v3131_v16  ;;  %v5177_v59 = vadd.f32 %v3543_v24, %v3139_v20 }
 0x95a   :  { %v3504_v3 = vpop.f32.mrf.mxu0  ;;  %v3545_v58 = vpop.f32.mrf.mxu1 }
 0x95b   :  { %v5179_v25 = vadd.f32 %v3504_v3, %v3135_v21  ;;  %v5181_v38 = vadd.f32 %v3545_v58, %v3143_v42 }
 0x95c   :  { %v3506_v41 = vpop.f32.mrf.mxu0  ;;  %v3547_v0 = vpop.f32.mrf.mxu1 }
 0x95d   :  { %v3550_v18 = vmax.f32 %v5175_v36, %v5179_v25  ;;  %v3551_v2 = vmax.f32 %v5177_v59, %v5181_v38 }
 0x95e   :  { %v3507_v11 = vpop.f32.mrf.mxu0  ;;  %v3548_v19 = vpop.f32.mrf.mxu1 }
 0x95f   :  { %v3552_v26 = vmax.f32 %v3550_v18, %v3551_v2 }
 0x961   :  { %3553 = vmax.xlane.f32.xlu0 %v3552_v26 }
 0x9ea   :  { %v3554_v28 = vpop.xlane.xlu0 %3553 }
 0x9eb   :  { %v3555_v5 = vsub.f32 %v5175_v36, %v3554_v28  ;;  %v3556_v29 = vsub.f32 %v5179_v25, %v3554_v28  ;;  %v3557_v31 = vsub.f32 %v5177_v59, %v3554_v28  ;;  %v3558_v14 = vsub.f32 %v5181_v38, %v3554_v28 }
 0x9ed   :  { %v3559_v44 = vmul.f32 1.442695, %v3555_v5  ;;  %v3561_v32 = vmul.f32 1.442695, %v3556_v29  ;;  %v3563_v33 = vmul.f32 1.442695, %v3557_v31 }
 0x9ee   :  { %v3565_v60 = vmul.f32 1.442695, %v3558_v14 }
 0x9ef   :  { %4663 = vpow2.f32 %v3559_v44 }
 0x9f0   :  { %4665 = vpow2.f32 %v3561_v32 }
 0x9f1   :  { %4667 = vpow2.f32 %v3563_v33 }
 0x9f2   :  { %4669 = vpow2.f32 %v3565_v60 }
 0x9fc   :  { %v4664_v34 = vpop.eup %4663 }
 0x9fd   :  { %v4666_v46 = vpop.eup %4665 }
 0x9fe   :  { %v3567_v47 = vadd.f32 %v4666_v46, %v4664_v34  ;;  %v4668_v37 = vpop.eup %4667 }
 0x9ff   :  { %v4670_v63 = vpop.eup %4669 }
 0xa00   :  { %v3568_v23 = vadd.f32 %v4668_v37, %v3567_v47 }
 0xa02   :  { %v3569_v17 = vadd.f32 %v4670_v63, %v3568_v23 }
 0xa04   :  { %3570 = vadd.xlane.f32.xlu1 %v3569_v17 }
 0xa05   :  { %4784 = shalt.err (!%p4781_p1)
}
 0xa06   :  { %3604 = dma.vmem_to_hbm [thread:$0]  %s3599_s7, 512, %s5220_s10, [#allocation14], %s4848_s29, %s4848_s29, %s4849_s30  }
 0xa07   :  { %s4858_s13 = smov [#allocation15]  }
 0xa08   :  { %s3610_s2 = sshll.u32 %s4858_s13, 4  ;;  %s3611_s2 = int_to_ptr.vmem [resolvable:$true] %s3610_s2 }
 0xa09   :  { %s4793_s14 = scalar_lea.vmem %s3611_s2, 512  ;;  %p4798_p3 = scmp.lt.s32.totalorder %s3611_s2, %s3611_s2 }
 0xa0a   :  { %p4794_p2 = scmp.ne.s32.totalorder %s3611_s2, %s4793_s14  ;;  %p4799_p4 = scmp.lt.s32.totalorder %s4793_s14, %s4793_s14 }
 0xa0c   :  { %p4800_p5 = por %p4799_p4, %p4798_p3 }
 0xa0e   :  { %p4801_p6 = pnand %p4800_p5, %p4794_p2 }
 0xa10   :  { %4804 = shalt.err (!%p4801_p6)
}
 0xa11   :  { %3616 = dma.vmem_to_hbm [thread:$0]  %s3611_s2, 512, %s5221_s11, [#allocation14], %s4848_s29, %s4848_s29, %s4849_s30  }
 0xa12   :  { %s4859_s10 = smov [#allocation12]  }
 0xa13   :  { %s3589_s16 = sshll.u32 %s4859_s10, 4  ;;  %s3590_s16 = int_to_ptr.vmem [resolvable:$true] %s3589_s16 }
 0xa14   :  { %s4813_s11 = scalar_lea.vmem %s3590_s16, 512  ;;  %p4818_p8 = scmp.lt.s32.totalorder %s3590_s16, %s3590_s16 }
 0xa15   :  { %p4814_p7 = scmp.ne.s32.totalorder %s3590_s16, %s4813_s11  ;;  %p4819_p9 = scmp.lt.s32.totalorder %s4813_s11, %s4813_s11 }
 0xa17   :  { %p4820_p10 = por %p4819_p9, %p4818_p8 }
 0xa19   :  { %p4821_p11 = pnand %p4820_p10, %p4814_p7 }
 0xa8d   :  { %v3571_v43 = vpop.xlane.xlu1 %3570 }
 0xa8e   :  { %4671 = vlog2.f32 %v3571_v43 }
 0xa9b   :  { %v4672_v48 = vpop.eup %4671 }
 0xa9c   :  { %v3573_v49 = vmul.f32 0.6931472, %v4672_v48 }
 0xa9e   :  { %v3574_v45 = vadd.f32 %v3573_v49, %v3554_v28 }
 0xaa0   :  { %v3575_v50 = vsub.f32 %v5175_v36, %v3574_v45  ;;  %v3576_v51 = vsub.f32 %v5179_v25, %v3574_v45  ;;  %v3577_v27 = vsub.f32 %v5177_v59, %v3574_v45  ;;  %v3578_v52 = vsub.f32 %v5181_v38, %v3574_v45 }
 0xaa2   :  { %3579 = vst [vmem:[#allocation12] sm:$0xff] %v3575_v50  ;;  %3580 = vst [vmem:[#allocation12 + $0x8] sm:$0xff] %v3576_v51 }
 0xaa3   :  { %3581 = vst [vmem:[#allocation12 + $0x10] sm:$0xff] %v3577_v27  ;;  %3582 = vst [vmem:[#allocation12 + $0x18] sm:$0xff] %v3578_v52 }
 0xaa4   :  { %4824 = shalt.err (!%p4821_p11)
}
 0xaa5   :  { %3592 = dma.vmem_to_hbm [thread:$0]  %s3590_s16, 512, %s5219_s9, [#allocation5]  }
 0xaa6   :  { %4839 = dma.done.wait [#allocation5], 512  }
 0xaa7   :  { %4840 = vsyncadd [#allocation5], 4294966784 }
 0xaa8   :  { %4841 = dma.done.wait [#allocation14], 1024  }
 0xaa9   :  { %4842 = vsyncadd [#allocation14], 4294966272 }
 0xaaa   :  { %3626 = vsyncpa [#allocation4], 1 }
 0xaab   :  { %3627 = vsyncpa [#allocation7], 1 }
 0xaac   :  { %3628 = vsyncpa [#allocation10], 1 }
 0xaad   :  { %3629 = vsyncpa [#allocation5], 1 }
 0xaae   :  { %3630 = vsyncpa [#allocation14], 1 }

</bundles_post_ra>
